<compile_context>
chip_gen: v7x
topology: tpu7x:2x2x1
jax: 0.10.0
libtpu: 0.0.40
codegen_flags: <defaults>
</compile_context>

<pallas_src>
import math

import jax
import jax.numpy as jnp
import numpy as np
from jax.experimental import pallas as pl
from jax.experimental.pallas import tpu as pltpu

NUM_HEADS = 4


def _tensorcores_per_chip():
    """Best-effort TensorCores-per-chip (v7x=2, v5e/v6e=1). Perf heuristic only."""
    try:
        kind = jax.devices()[0].device_kind.lower()
    except Exception:
        return 1
    return 2 if "v7" in kind else 1


def _pick_block_batch(bsz, q_len, kv_len, hidden, n_cores):
    """Largest divisor of bsz whose per-step working set fits comfortably in VMEM,
    while keeping >= n_cores 'parallel' grid steps on multi-TensorCore chips."""

    def step_bytes(bt):
        # double-buffered q/out/k/mask blocks + live f32 scores/probs + resident weights
        act = bt * (2 * q_len * hidden + kv_len * hidden + q_len * kv_len) * 4
        scores = bt * NUM_HEADS * q_len * kv_len * 4
        weights = 4 * hidden * hidden * 4
        return 2 * act + 2 * scores + weights

    budget = 24 << 20  # stay under v7x's 32 MiB scoped-VMEM default (64 MiB physical)
    best = 1
    for d in range(1, bsz + 1):
        if bsz % d:
            continue
        if step_bytes(d) > budget:
            continue
        if n_cores > 1 and bsz >= n_cores and (bsz // d) < n_cores:
            continue  # keep one parallel step per TensorCore on v7x
        best = d
    return best


def _make_kernel(bt, q_len, kv_len, hidden, num_heads, matmul_dtype):
    head_dim = hidden // num_heads
    scale = 1.0 / math.sqrt(head_dim)
    neg_min = float(jnp.finfo(jnp.float32).min)
    bh = bt * num_heads
    f32 = jnp.float32

    def kernel(q_ref, k_ref, mask_ref, wqt_ref, wkt_ref, wvt_ref, wot_ref, out_ref):
        # Flatten (bt, seq, hidden) -> (bt*seq, hidden); hidden stays on the lane axis.
        q2d = q_ref[...].reshape(bt * q_len, hidden).astype(matmul_dtype)
        k2d = k_ref[...].reshape(bt * kv_len, hidden).astype(matmul_dtype)
        mask = mask_ref[...].astype(f32)                              # (bt, q, kv)

        # nn.Linear(bias=False): y = x @ W.T; weights arrive pre-transposed / pre-cast.
        qp = jnp.dot(q2d, wqt_ref[...], preferred_element_type=f32)   # (bt*q, H)
        kp = jnp.dot(k2d, wkt_ref[...], preferred_element_type=f32)   # (bt*kv, H)
        vp = jnp.dot(k2d, wvt_ref[...], preferred_element_type=f32)   # (bt*kv, H)

        def heads_T(x, seq):
            # (bt*seq, H) -> (bt*nh, head_dim, seq): one minor-2D transpose plus
            # sublane-aligned reshapes; avoids per-head 8-lane slices of x.
            xT = jnp.swapaxes(x.reshape(bt, seq, hidden), 1, 2)       # (bt, H, seq)
            return xT.reshape(bh, head_dim, seq)

        qT = heads_T(qp, q_len)                                       # (bh, hd, q)
        kT = heads_T(kp, kv_len)                                      # (bh, hd, kv)
        vT = heads_T(vp, kv_len)                                      # (bh, hd, kv)
        q3 = jnp.swapaxes(qT, 1, 2)                                   # (bh, q, hd)

        # All-head QK^T in one batched matmul: scores[b,i,j] = sum_d q3[b,i,d]*kT[b,d,j]
        scores = jax.lax.dot_general(
            q3.astype(matmul_dtype), kT.astype(matmul_dtype),
            dimension_numbers=(((2,), (1,)), ((0,), (0,))),
            preferred_element_type=f32) * scale                       # (bh, q, kv)

        s4 = scores.reshape(bt, num_heads, q_len, kv_len)
        s4 = s4 + mask[:, None, :, :]                                 # one broadcast add
        s4 = jnp.maximum(s4, neg_min)                                 # torch.max(w, finfo.min)

        # Explicit f32 softmax; the per-row divide runs on the EUP via pl.reciprocal.
        row_max = jnp.max(s4, axis=-1, keepdims=True)
        num = jnp.exp(s4 - row_max)
        denom = jnp.sum(num, axis=-1, keepdims=True)
        probs = num * pl.reciprocal(denom, approx=False)

        # All-head P@V in one batched matmul: attn[b,i,d] = sum_j p[b,i,j]*vT[b,d,j]
        p3 = probs.reshape(bh, q_len, kv_len).astype(matmul_dtype)
        attn = jax.lax.dot_general(
            p3, vT.astype(matmul_dtype),
            dimension_numbers=(((2,), (2,)), ((0,), (0,))),
            preferred_element_type=f32)                               # (bh, q, hd)

        # Regroup heads -> (bt*q_len, H) and run ONE K=H output projection.
        aT = jnp.swapaxes(attn, 1, 2).reshape(bt, hidden, q_len)      # (bt, H, q)
        a2d = jnp.swapaxes(aT, 1, 2).reshape(bt * q_len, hidden)      # (bt*q, H)
        out2d = jnp.dot(a2d.astype(matmul_dtype), wot_ref[...],
                        preferred_element_type=f32)                   # (bt*q, H)

        out_ref[...] = out2d.reshape(bt, q_len, hidden).astype(out_ref.dtype)

    return kernel


def kg_adapter_cross_attention(q_hidden, k_hidden, attention_mask, wq, wk, wv, wo,
                               block_batch=None, matmul_dtype=None):
    """q_hidden: (B, q_len, H); k_hidden: (B, kv_len, H);
    attention_mask: additive, (B, 1, q_len, kv_len) or (B, q_len, kv_len);
    wq/wk/wv/wo: (H, H) in PyTorch nn.Linear layout (y = x @ W.T).
    matmul_dtype: dtype of MXU operands (default: input dtype). Pass jnp.bfloat16 on
    v6e/v7x for bf16-native MXU throughput; mask/clamp/softmax always stay f32."""
    bsz, q_len, hidden = q_hidden.shape
    kv_len = k_hidden.shape[1]
    assert hidden % NUM_HEADS == 0

    # Squeeze the size-1 head dim of the mask up front (metadata-only XLA reshape).
    if attention_mask.ndim == 4:
        attention_mask = attention_mask.reshape(bsz, q_len, kv_len)

    if matmul_dtype is None:
        matmul_dtype = q_hidden.dtype

    n_cores = _tensorcores_per_chip()
    if block_batch is None:
        bt = _pick_block_batch(bsz, q_len, kv_len, hidden, n_cores)
    else:
        # Snap to a divisor of bsz so no padding / tail handling is ever needed.
        req = max(1, min(int(block_batch), bsz))
        bt = max(d for d in range(1, req + 1) if bsz % d == 0)
    num_blocks = bsz // bt

    # One-time XLA-side weight transposes (and optional cast) outside the kernel.
    wqt = wq.T.astype(matmul_dtype)
    wkt = wk.T.astype(matmul_dtype)
    wvt = wv.T.astype(matmul_dtype)
    wot = wo.T.astype(matmul_dtype)

    kernel = _make_kernel(bt, q_len, kv_len, hidden, NUM_HEADS, matmul_dtype)
    w_spec = pl.BlockSpec((hidden, hidden), lambda b: (0, 0))

    return pl.pallas_call(
        kernel,
        out_shape=jax.ShapeDtypeStruct((bsz, q_len, hidden), q_hidden.dtype),
        grid=(num_blocks,),
        in_specs=[
            pl.BlockSpec((bt, q_len, hidden), lambda b: (b, 0, 0)),
            pl.BlockSpec((bt, kv_len, hidden), lambda b: (b, 0, 0)),
            pl.BlockSpec((bt, q_len, kv_len), lambda b: (b, 0, 0)),
            w_spec, w_spec, w_spec, w_spec,
        ],
        out_specs=pl.BlockSpec((bt, q_len, hidden), lambda b: (b, 0, 0)),
        compiler_params=pltpu.CompilerParams(
            dimension_semantics=("parallel",)),
    )(q_hidden, k_hidden, attention_mask, wqt, wkt, wvt, wot)


def _reference(q_hidden, k_hidden, attention_mask, wq, wk, wv, wo):
    """Pure-JAX re-implementation of the PyTorch forward, for verification."""
    bsz, q_len, hidden = q_hidden.shape
    kv_len = k_hidden.shape[1]
    head_dim = hidden // NUM_HEADS

    def split_heads(x, seq):
        return x.reshape(bsz, seq, NUM_HEADS, head_dim).transpose(0, 2, 1, 3)

    q = split_heads(q_hidden @ wq.T, q_len)
    k = split_heads(k_hidden @ wk.T, kv_len)
    v = split_heads(k_hidden @ wv.T, kv_len)

    w = jnp.einsum("bhqd,bhkd->bhqk", q, k) / math.sqrt(head_dim)
    w = w + attention_mask
    w = jnp.maximum(w, jnp.finfo(jnp.float32).min)
    w = jax.nn.softmax(w.astype(jnp.float32), axis=-1)
    out = jnp.einsum("bhqk,bhkd->bhqd", w, v)
    out = out.transpose(0, 2, 1, 3).reshape(bsz, q_len, hidden)
    return out @ wo.T


if __name__ == "__main__":
    # Small shapes consistent with the module: hidden=32 -> head_dim=8, 4 heads.
    bsz, q_len, kv_len, hidden = 8, 8, 16, 32

    key = jax.random.PRNGKey(0)
    k0, k1, k2, k3, k4, k5, k6 = jax.random.split(key, 7)

    q_hidden = jax.random.normal(k0, (bsz, q_len, hidden), dtype=jnp.float32)
    k_hidden = jax.random.normal(k1, (bsz, kv_len, hidden), dtype=jnp.float32)

    # Additive attention mask: randomly mask ~25% of kv positions with a large negative.
    mask_bits = jax.random.bernoulli(k2, p=0.25, shape=(bsz, 1, q_len, kv_len))
    attention_mask = jnp.where(mask_bits, jnp.float32(-1e9), jnp.float32(0.0))

    # Deterministic params (shapes from __init__: all Linear(hidden, hidden, bias=False)).
    init_scale = 1.0 / math.sqrt(hidden)
    wq = jax.random.uniform(k3, (hidden, hidden), jnp.float32, -init_scale, init_scale)
    wk = jax.random.uniform(k4, (hidden, hidden), jnp.float32, -init_scale, init_scale)
    wv = jax.random.uniform(k5, (hidden, hidden), jnp.float32, -init_scale, init_scale)
    wo = jax.random.uniform(k6, (hidden, hidden), jnp.float32, -init_scale, init_scale)

    ref = _reference(q_hidden, k_hidden, attention_mask, wq, wk, wv, wo)

    # Exact-f32 path (default): tight tolerance against the reference.
    out = kg_adapter_cross_attention(q_hidden, k_hidden, attention_mask,
                                     wq, wk, wv, wo)
    out = jax.block_until_ready(out)
    np.testing.assert_allclose(np.asarray(out), np.asarray(ref),
                               rtol=1e-5, atol=1e-5)

    # bf16 MXU-operand path (v6e/v7x-native matmuls; softmax stays f32): loose tolerance.
    out_bf16 = kg_adapter_cross_attention(q_hidden, k_hidden, attention_mask,
                                          wq, wk, wv, wo,
                                          matmul_dtype=jnp.bfloat16)
    out_bf16 = jax.block_until_ready(out_bf16)
    np.testing.assert_allclose(np.asarray(out_bf16), np.asarray(ref),
                               rtol=5e-2, atol=5e-2)

    print("KERNEL_OK")
</pallas_src>

<mosaic_0001>
module attributes {stable_mosaic.version = 11 : i64} {
  func.func @kernel(%arg0: i32, %arg1: memref<8x8x32xf32, #tpu.memory_space<vmem>>, %arg2: memref<8x16x32xf32, #tpu.memory_space<vmem>>, %arg3: memref<8x8x16xf32, #tpu.memory_space<vmem>>, %arg4: memref<32x32xf32, #tpu.memory_space<vmem>>, %arg5: memref<32x32xf32, #tpu.memory_space<vmem>>, %arg6: memref<32x32xf32, #tpu.memory_space<vmem>>, %arg7: memref<32x32xf32, #tpu.memory_space<vmem>>, %arg8: memref<8x8x32xf32, #tpu.memory_space<vmem>>) attributes {dimension_semantics = [#tpu.dimension_semantics<parallel>], iteration_bounds = array<i64: 1>, scalar_prefetch = 0 : i64, scratch_operands = 0 : i64, tpu.core_type = #tpu.core_type<tc>, window_params = [{transform_indices = @transform_0, window_bounds = array<i64: 8, 8, 32>}, {transform_indices = @transform_1, window_bounds = array<i64: 8, 16, 32>}, {transform_indices = @transform_2, window_bounds = array<i64: 8, 8, 16>}, {pipeline_mode = #tpu.pipeline_mode<synchronous>, transform_indices = @transform_3, window_bounds = array<i64: 32, 32>}, {pipeline_mode = #tpu.pipeline_mode<synchronous>, transform_indices = @transform_4, window_bounds = array<i64: 32, 32>}, {pipeline_mode = #tpu.pipeline_mode<synchronous>, transform_indices = @transform_5, window_bounds = array<i64: 32, 32>}, {pipeline_mode = #tpu.pipeline_mode<synchronous>, transform_indices = @transform_6, window_bounds = array<i64: 32, 32>}, {transform_indices = @transform_7, window_bounds = array<i64: 8, 8, 32>}]} {
    %c0 = arith.constant 0 : index
    %c0_0 = arith.constant 0 : index
    %c0_1 = arith.constant 0 : index
    %0 = vector.load %arg1[%c0, %c0_0, %c0_1] : memref<8x8x32xf32, #tpu.memory_space<vmem>>, vector<8x8x32xf32>
    %1 = vector.shape_cast %0 : vector<8x8x32xf32> to vector<64x32xf32>
    %c0_2 = arith.constant 0 : index
    %c0_3 = arith.constant 0 : index
    %c0_4 = arith.constant 0 : index
    %2 = vector.load %arg2[%c0_2, %c0_3, %c0_4] : memref<8x16x32xf32, #tpu.memory_space<vmem>>, vector<8x16x32xf32>
    %3 = vector.shape_cast %2 : vector<8x16x32xf32> to vector<128x32xf32>
    %c0_5 = arith.constant 0 : index
    %c0_6 = arith.constant 0 : index
    %c0_7 = arith.constant 0 : index
    %4 = vector.load %arg3[%c0_5, %c0_6, %c0_7] : memref<8x8x16xf32, #tpu.memory_space<vmem>>, vector<8x8x16xf32>
    %c0_8 = arith.constant 0 : index
    %c0_9 = arith.constant 0 : index
    %5 = vector.load %arg4[%c0_8, %c0_9] : memref<32x32xf32, #tpu.memory_space<vmem>>, vector<32x32xf32>
    %cst = arith.constant dense<0.000000e+00> : vector<64x32xf32>
    %6 = tpu.matmul %1, %5, %cst {dimension_numbers = #tpu.dot_dimension_numbers<[1], [0], [0], [1], [0, 0, 1, 1], [], []>} : vector<64x32xf32>, vector<32x32xf32>, vector<64x32xf32> -> vector<64x32xf32>
    %c0_10 = arith.constant 0 : index
    %c0_11 = arith.constant 0 : index
    %7 = vector.load %arg5[%c0_10, %c0_11] : memref<32x32xf32, #tpu.memory_space<vmem>>, vector<32x32xf32>
    %cst_12 = arith.constant dense<0.000000e+00> : vector<128x32xf32>
    %8 = tpu.matmul %3, %7, %cst_12 {dimension_numbers = #tpu.dot_dimension_numbers<[1], [0], [0], [1], [0, 0, 1, 1], [], []>} : vector<128x32xf32>, vector<32x32xf32>, vector<128x32xf32> -> vector<128x32xf32>
    %c0_13 = arith.constant 0 : index
    %c0_14 = arith.constant 0 : index
    %9 = vector.load %arg6[%c0_13, %c0_14] : memref<32x32xf32, #tpu.memory_space<vmem>>, vector<32x32xf32>
    %cst_15 = arith.constant dense<0.000000e+00> : vector<128x32xf32>
    %10 = tpu.matmul %3, %9, %cst_15 {dimension_numbers = #tpu.dot_dimension_numbers<[1], [0], [0], [1], [0, 0, 1, 1], [], []>} : vector<128x32xf32>, vector<32x32xf32>, vector<128x32xf32> -> vector<128x32xf32>
    %11 = vector.shape_cast %6 : vector<64x32xf32> to vector<8x8x32xf32>
    %12 = tpu.transpose %11, [0, 2, 1] : vector<8x8x32xf32> -> vector<8x32x8xf32>
    %13 = vector.shape_cast %12 : vector<8x32x8xf32> to vector<32x8x8xf32>
    %14 = vector.shape_cast %8 : vector<128x32xf32> to vector<8x16x32xf32>
    %15 = tpu.transpose %14, [0, 2, 1] : vector<8x16x32xf32> -> vector<8x32x16xf32>
    %16 = vector.shape_cast %15 : vector<8x32x16xf32> to vector<32x8x16xf32>
    %17 = vector.shape_cast %10 : vector<128x32xf32> to vector<8x16x32xf32>
    %18 = tpu.transpose %17, [0, 2, 1] : vector<8x16x32xf32> -> vector<8x32x16xf32>
    %19 = vector.shape_cast %18 : vector<8x32x16xf32> to vector<32x8x16xf32>
    %20 = tpu.transpose %13, [0, 2, 1] : vector<32x8x8xf32> -> vector<32x8x8xf32>
    %cst_16 = arith.constant dense<0.000000e+00> : vector<32x8x16xf32>
    %21 = tpu.matmul %20, %16, %cst_16 {dimension_numbers = #tpu.dot_dimension_numbers<[2], [1], [1], [2], [0, 0, 0, 1, 1, 2], [0], [0]>} : vector<32x8x8xf32>, vector<32x8x16xf32>, vector<32x8x16xf32> -> vector<32x8x16xf32>
    %cst_17 = arith.constant 0.353553385 : f32
    %22 = vector.broadcast %cst_17 : f32 to vector<32x8x16xf32>
    %23 = arith.mulf %21, %22 : vector<32x8x16xf32>
    %24 = vector.shape_cast %23 : vector<32x8x16xf32> to vector<8x4x8x16xf32>
    %25 = vector.shape_cast %4 : vector<8x8x16xf32> to vector<8x1x8x16xf32>
    %26 = vector.broadcast %25 : vector<8x1x8x16xf32> to vector<8x4x8x16xf32>
    %27 = arith.addf %24, %26 : vector<8x4x8x16xf32>
    %cst_18 = arith.constant -3.40282347E+38 : f32
    %28 = vector.broadcast %cst_18 : f32 to vector<8x4x8x16xf32>
    %29 = arith.maximumf %27, %28 : vector<8x4x8x16xf32>
    %cst_19 = arith.constant dense<0xFF800000> : vector<8x4x8xf32>
    %30 = vector.multi_reduction <maximumf>, %29, %cst_19 [3] : vector<8x4x8x16xf32> to vector<8x4x8xf32>
    %31 = vector.shape_cast %30 : vector<8x4x8xf32> to vector<8x4x8x1xf32>
    %32 = vector.broadcast %31 : vector<8x4x8x1xf32> to vector<8x4x8x16xf32>
    %33 = arith.subf %29, %32 : vector<8x4x8x16xf32>
    %34 = math.exp %33 : vector<8x4x8x16xf32>
    %cst_20 = arith.constant dense<0.000000e+00> : vector<8x4x8xf32>
    %35 = vector.multi_reduction <add>, %34, %cst_20 [3] : vector<8x4x8x16xf32> to vector<8x4x8xf32>
    %36 = vector.shape_cast %35 : vector<8x4x8xf32> to vector<8x4x8x1xf32>
    %37 = tpu.reciprocal %36 : vector<8x4x8x1xf32> -> vector<8x4x8x1xf32>
    %38 = vector.broadcast %37 : vector<8x4x8x1xf32> to vector<8x4x8x16xf32>
    %39 = arith.mulf %34, %38 : vector<8x4x8x16xf32>
    %40 = vector.shape_cast %39 : vector<8x4x8x16xf32> to vector<32x8x16xf32>
    %cst_21 = arith.constant dense<0.000000e+00> : vector<32x8x8xf32>
    %41 = tpu.matmul %40, %19, %cst_21 {dimension_numbers = #tpu.dot_dimension_numbers<[2], [2], [1], [1], [0, 0, 0, 1, 1, 1], [0], [0]>} : vector<32x8x16xf32>, vector<32x8x16xf32>, vector<32x8x8xf32> -> vector<32x8x8xf32>
    %42 = tpu.transpose %41, [0, 2, 1] : vector<32x8x8xf32> -> vector<32x8x8xf32>
    %43 = vector.shape_cast %42 : vector<32x8x8xf32> to vector<8x32x8xf32>
    %44 = tpu.transpose %43, [0, 2, 1] : vector<8x32x8xf32> -> vector<8x8x32xf32>
    %45 = vector.shape_cast %44 : vector<8x8x32xf32> to vector<64x32xf32>
    %c0_22 = arith.constant 0 : index
    %c0_23 = arith.constant 0 : index
    %46 = vector.load %arg7[%c0_22, %c0_23] : memref<32x32xf32, #tpu.memory_space<vmem>>, vector<32x32xf32>
    %cst_24 = arith.constant dense<0.000000e+00> : vector<64x32xf32>
    %47 = tpu.matmul %45, %46, %cst_24 {dimension_numbers = #tpu.dot_dimension_numbers<[1], [0], [0], [1], [0, 0, 1, 1], [], []>} : vector<64x32xf32>, vector<32x32xf32>, vector<64x32xf32> -> vector<64x32xf32>
    %48 = vector.shape_cast %47 : vector<64x32xf32> to vector<8x8x32xf32>
    %c0_25 = arith.constant 0 : index
    %c0_26 = arith.constant 0 : index
    %c0_27 = arith.constant 0 : index
    %49 = vector.load %arg8[%c0_25, %c0_26, %c0_27] : memref<8x8x32xf32, #tpu.memory_space<vmem>>, vector<8x8x32xf32>
    tpu.vector_store %arg8[%c0_25, %c0_26, %c0_27], %48 {strides = array<i32>} : memref<8x8x32xf32, #tpu.memory_space<vmem>>, vector<8x8x32xf32>,
    return
  }
  func.func @transform_0(%arg0: i32) -> (i32, i32, i32) {
    %c0_i32 = arith.constant 0 : i32
    %c0_i32_0 = arith.constant 0 : i32
    %c0_i32_1 = arith.constant 0 : i32
    return %arg0, %c0_i32, %c0_i32_0 : i32, i32, i32
  }
  func.func @transform_1(%arg0: i32) -> (i32, i32, i32) {
    %c0_i32 = arith.constant 0 : i32
    %c0_i32_0 = arith.constant 0 : i32
    %c0_i32_1 = arith.constant 0 : i32
    return %arg0, %c0_i32, %c0_i32_0 : i32, i32, i32
  }
  func.func @transform_2(%arg0: i32) -> (i32, i32, i32) {
    %c0_i32 = arith.constant 0 : i32
    %c0_i32_0 = arith.constant 0 : i32
    %c0_i32_1 = arith.constant 0 : i32
    return %arg0, %c0_i32, %c0_i32_0 : i32, i32, i32
  }
  func.func @transform_3(%arg0: i32) -> (i32, i32) {
    %c0_i32 = arith.constant 0 : i32
    %c0_i32_0 = arith.constant 0 : i32
    %c0_i32_1 = arith.constant 0 : i32
    return %c0_i32, %c0_i32_0 : i32, i32
  }
  func.func @transform_4(%arg0: i32) -> (i32, i32) {
    %c0_i32 = arith.constant 0 : i32
    %c0_i32_0 = arith.constant 0 : i32
    %c0_i32_1 = arith.constant 0 : i32
    return %c0_i32, %c0_i32_0 : i32, i32
  }
  func.func @transform_5(%arg0: i32) -> (i32, i32) {
    %c0_i32 = arith.constant 0 : i32
    %c0_i32_0 = arith.constant 0 : i32
    %c0_i32_1 = arith.constant 0 : i32
    return %c0_i32, %c0_i32_0 : i32, i32
  }
  func.func @transform_6(%arg0: i32) -> (i32, i32) {
    %c0_i32 = arith.constant 0 : i32
    %c0_i32_0 = arith.constant 0 : i32
    %c0_i32_1 = arith.constant 0 : i32
    return %c0_i32, %c0_i32_0 : i32, i32
  }
  func.func @transform_7(%arg0: i32) -> (i32, i32, i32) {
    %c0_i32 = arith.constant 0 : i32
    %c0_i32_0 = arith.constant 0 : i32
    %c0_i32_1 = arith.constant 0 : i32
    return %arg0, %c0_i32, %c0_i32_0 : i32, i32, i32
  }
}

</mosaic_0001>

<bundles_post_ra>
// kernel: tpu_custom_call.1
= control target key start
LH: loop header
LB: loop body
LE: loop exit
PB: predicated region body
PF: predicated region fallthrough
CT: control target
= control target key end

     0   :  { %12 = vsyncpa [#allocation3], 0  ;;  %s11394_s0 = inlined_call_operand.hbm [shape: f32[8,8,32], index: 0, kind: input, shape index: {}]   ;;  %s11395_s1 = inlined_call_operand.hbm [shape: f32[8,16,32], index: 1, kind: input, shape index: {}]   ;;  %s11396_s2 = inlined_call_operand.hbm [shape: f32[8,8,16], index: 2, kind: input, shape index: {}]   ;;  %s11397_s3 = inlined_call_operand.hbm [shape: f32[32,32], index: 3, kind: input, shape index: {}]   ;;  %s11398_s4 = inlined_call_operand.hbm [shape: f32[32,32], index: 4, kind: input, shape index: {}]   ;;  %s11399_s5 = inlined_call_operand.hbm [shape: f32[32,32], index: 5, kind: input, shape index: {}]   ;;  %s11400_s6 = inlined_call_operand.hbm [shape: f32[32,32], index: 6, kind: input, shape index: {}]   ;;  %s11401_s7 = inlined_call_operand.hbm [shape: f32[8,8,32], index: 7, kind: output, shape index: {}]  }
   0x1   :  { %13 = vsyncpa [#allocation6], 0 }
   0x2   :  { %14 = vsyncpa [#allocation9], 0 }
   0x3   :  { %15 = vsyncpa [#allocation12], 0 }
   0x4   :  { %16 = vsyncpa [#allocation4], 0  ;;  %s10207_s24 = smov [#allocation5]   ;;  %s10208_s26 = smov [#allocation8]  }
   0x5   :  { %s34_s25 = sshll.u32 %s10207_s24, 4  ;;  %s58_s27 = sshll.u32 %s10208_s26, 4  ;;  %s35_s25 = int_to_ptr.vmem [resolvable:$true] %s34_s25  ;;  %s10259_s27 = int_to_ptr.vmem [resolvable:$true] %s58_s27 }
   0x6   :  { %s10021_s30 = scalar_lea.hbm %s11395_s1, 2048 }
   0x7   :  { %p10022_p0 = scmp.ne.s32.totalorder %s11395_s1, %s10021_s30  ;;  %p10025_p1 = scmp.lt.u32.totalorder %s10021_s30, %s11395_s1 }
   0x9   :  { %p10027_p2 = pnand %p10025_p1, %p10022_p0 }
   0xb   :  { %10030 = shalt.err (!%p10027_p2)
}
   0xc   :  { %s10031_s12 = scalar_lea.vmem %s35_s25, 2048  ;;  %p10036_p4 = scmp.lt.s32.totalorder %s35_s25, %s35_s25 }
   0xd   :  { %p10032_p3 = scmp.ne.s32.totalorder %s35_s25, %s10031_s12  ;;  %p10037_p5 = scmp.lt.s32.totalorder %s10031_s12, %s10031_s12 }
   0xf   :  { %p10038_p6 = por %p10037_p5, %p10036_p4 }
  0x11   :  { %p10039_p7 = pnand %p10038_p6, %p10032_p3 }
  0x13   :  { %10042 = shalt.err (!%p10039_p7)
}
  0x14   :  { %s10209_s13 = smov 128   ;;  %s10210_s14 = smov 8  }
  0x15   :  { %40 = dma.hbm_to_vmem [thread:$0]  %s11395_s1, 2048, %s35_s25, [#allocation6], %s10209_s13, %s10209_s13, %s10210_s14  }
  0x16   :  { %s10043_s19 = scalar_lea.hbm %s11397_s3, 512 }
  0x17   :  { %p10044_p8 = scmp.ne.s32.totalorder %s11397_s3, %s10043_s19  ;;  %p10047_p9 = scmp.lt.u32.totalorder %s10043_s19, %s11397_s3 }
  0x19   :  { %p10049_p10 = pnand %p10047_p9, %p10044_p8 }
  0x1b   :  { %10052 = shalt.err (!%p10049_p10)
}
  0x1c   :  { %s10053_s24 = scalar_lea.vmem %s10259_s27, 512  ;;  %p10058_p12 = scmp.lt.s32.totalorder %s10259_s27, %s10259_s27 }
  0x1d   :  { %p10054_p11 = scmp.ne.s32.totalorder %s10259_s27, %s10053_s24  ;;  %p10059_p13 = scmp.lt.s32.totalorder %s10053_s24, %s10053_s24 }
  0x1f   :  { %p10060_p0 = por %p10059_p13, %p10058_p12 }
  0x21   :  { %p10061_p1 = pnand %p10060_p0, %p10054_p11 }
  0x23   :  { %10064 = shalt.err (!%p10061_p1)
}
  0x24   :  { %64 = dma.hbm_to_vmem [thread:$0]  %s11397_s3, 512, %s10259_s27, [#allocation9], %s10209_s13, %s10209_s13, %s10210_s14  }
  0x25   :  { %s10211_s26 = smov [#allocation11]   ;;  %s10212_s29 = smov [#allocation2]  }
  0x26   :  { %s82_s28 = sshll.u32 %s10211_s26, 4  ;;  %s22_s30 = sshll.u32 %s10212_s29, 4  ;;  %s83_s28 = int_to_ptr.vmem [resolvable:$true] %s82_s28  ;;  %s10296_s30 = int_to_ptr.vmem [resolvable:$true] %s22_s30 }
  0x27   :  { %s10065_s10 = scalar_lea.hbm %s11399_s5, 512 }
  0x28   :  { %p10066_p2 = scmp.ne.s32.totalorder %s11399_s5, %s10065_s10  ;;  %p10069_p3 = scmp.lt.u32.totalorder %s10065_s10, %s11399_s5 }
  0x2a   :  { %p10071_p4 = pnand %p10069_p3, %p10066_p2 }
  0x2c   :  { %10074 = shalt.err (!%p10071_p4)
}
  0x2d   :  { %s10075_s3 = scalar_lea.vmem %s83_s28, 512  ;;  %p10080_p6 = scmp.lt.s32.totalorder %s83_s28, %s83_s28 }
  0x2e   :  { %p10076_p5 = scmp.ne.s32.totalorder %s83_s28, %s10075_s3  ;;  %p10081_p7 = scmp.lt.s32.totalorder %s10075_s3, %s10075_s3 }
  0x30   :  { %p10082_p8 = por %p10081_p7, %p10080_p6 }
  0x32   :  { %p10083_p9 = pnand %p10082_p8, %p10076_p5 }
  0x34   :  { %10086 = shalt.err (!%p10083_p9)
}
  0x35   :  { %88 = dma.hbm_to_vmem [thread:$0]  %s11399_s5, 512, %s83_s28, [#allocation12], %s10209_s13, %s10209_s13, %s10210_s14  }
  0x36   :  { %s10087_s20 = scalar_lea.hbm %s11394_s0, 1024 }
  0x37   :  { %p10088_p10 = scmp.ne.s32.totalorder %s11394_s0, %s10087_s20  ;;  %p10091_p11 = scmp.lt.u32.totalorder %s10087_s20, %s11394_s0 }
  0x39   :  { %p10093_p12 = pnand %p10091_p11, %p10088_p10 }
  0x3b   :  { %10096 = shalt.err (!%p10093_p12)
}
  0x3c   :  { %s10097_s1 = scalar_lea.vmem %s10296_s30, 1024  ;;  %p10102_p0 = scmp.lt.s32.totalorder %s10296_s30, %s10296_s30 }
  0x3d   :  { %p10098_p13 = scmp.ne.s32.totalorder %s10296_s30, %s10097_s1  ;;  %p10103_p1 = scmp.lt.s32.totalorder %s10097_s1, %s10097_s1 }
  0x3f   :  { %p10104_p2 = por %p10103_p1, %p10102_p0 }
  0x41   :  { %p10105_p3 = pnand %p10104_p2, %p10098_p13 }
  0x43   :  { %10108 = shalt.err (!%p10105_p3)
}
  0x44   :  { %28 = dma.hbm_to_vmem [thread:$0]  %s11394_s0, 1024, %s10296_s30, [#allocation3], %s10209_s13, %s10209_s13, %s10210_s14  }
  0x45   :  { %s10213_s26 = smov [#allocation7]   ;;  %s10214_s29 = smov [#allocation10]  }
  0x46   :  { %s46_s28 = sshll.u32 %s10213_s26, 4  ;;  %s70_s8 = sshll.u32 %s10214_s29, 4  ;;  %s47_s28 = int_to_ptr.vmem [resolvable:$true] %s46_s28  ;;  %s10333_s8 = int_to_ptr.vmem [resolvable:$true] %s70_s8 }
  0x47   :  { %s10109_s11 = scalar_lea.hbm %s11396_s2, 1024 }
  0x48   :  { %p10110_p4 = scmp.ne.s32.totalorder %s11396_s2, %s10109_s11  ;;  %p10113_p5 = scmp.lt.u32.totalorder %s10109_s11, %s11396_s2 }
  0x4a   :  { %p10115_p6 = pnand %p10113_p5, %p10110_p4 }
  0x4c   :  { %10118 = shalt.err (!%p10115_p6)
}
  0x4d   :  { %s10119_s0 = scalar_lea.vmem %s47_s28, 1024  ;;  %p10124_p8 = scmp.lt.s32.totalorder %s47_s28, %s47_s28 }
  0x4e   :  { %p10120_p7 = scmp.ne.s32.totalorder %s47_s28, %s10119_s0  ;;  %p10125_p9 = scmp.lt.s32.totalorder %s10119_s0, %s10119_s0 }
  0x50   :  { %p10126_p10 = por %p10125_p9, %p10124_p8 }
  0x52   :  { %p10127_p11 = pnand %p10126_p10, %p10120_p7 }
  0x54   :  { %10130 = shalt.err (!%p10127_p11)
}
  0x55   :  { %52 = dma.hbm_to_vmem [thread:$0]  %s11396_s2, 1024, %s47_s28, [#allocation6], %s10209_s13, %s10209_s13, %s10210_s14  }
  0x56   :  { %s10131_s19 = scalar_lea.hbm %s11398_s4, 512 }
  0x57   :  { %p10132_p12 = scmp.ne.s32.totalorder %s11398_s4, %s10131_s19  ;;  %p10135_p13 = scmp.lt.u32.totalorder %s10131_s19, %s11398_s4 }
  0x59   :  { %p10137_p0 = pnand %p10135_p13, %p10132_p12 }
  0x5b   :  { %10140 = shalt.err (!%p10137_p0)
}
  0x5c   :  { %s10141_s24 = scalar_lea.vmem %s10333_s8, 512  ;;  %p10146_p2 = scmp.lt.s32.totalorder %s10333_s8, %s10333_s8 }
  0x5d   :  { %p10142_p1 = scmp.ne.s32.totalorder %s10333_s8, %s10141_s24  ;;  %p10147_p3 = scmp.lt.s32.totalorder %s10141_s24, %s10141_s24 }
  0x5f   :  { %p10148_p4 = por %p10147_p3, %p10146_p2 }
  0x61   :  { %p10149_p5 = pnand %p10148_p4, %p10142_p1 }
  0x63   :  { %10152 = shalt.err (!%p10149_p5)
}
  0x64   :  { %76 = dma.hbm_to_vmem [thread:$0]  %s11398_s4, 512, %s10333_s8, [#allocation9], %s10209_s13, %s10209_s13, %s10210_s14  }
  0x65   :  { %s10215_s5 = smov [#allocation13]   ;;  %s10153_s29 = scalar_lea.hbm %s11400_s6, 512 }
  0x66   :  { %s94_s25 = sshll.u32 %s10215_s5, 4  ;;  %p10154_p6 = scmp.ne.s32.totalorder %s11400_s6, %s10153_s29  ;;  %s95_s25 = int_to_ptr.vmem [resolvable:$true] %s94_s25 }
  0x67   :  { %p10157_p7 = scmp.lt.u32.totalorder %s10153_s29, %s11400_s6 }
  0x69   :  { %p10159_p8 = pnand %p10157_p7, %p10154_p6 }
  0x6b   :  { %10162 = shalt.err (!%p10159_p8)
}
  0x6c   :  { %s10163_s15 = scalar_lea.vmem %s95_s25, 512  ;;  %p10168_p10 = scmp.lt.s32.totalorder %s95_s25, %s95_s25 }
  0x6d   :  { %p10164_p9 = scmp.ne.s32.totalorder %s95_s25, %s10163_s15  ;;  %p10169_p11 = scmp.lt.s32.totalorder %s10163_s15, %s10163_s15 }
  0x6f   :  { %p10170_p12 = por %p10169_p11, %p10168_p10 }
  0x71   :  { %p10171_p13 = pnand %p10170_p12, %p10164_p9 }
  0x73   :  { %10174 = shalt.err (!%p10171_p13)
}
  0x74   :  { %100 = dma.hbm_to_vmem [thread:$0]  %s11400_s6, 512, %s95_s25, [#allocation12], %s10209_s13, %s10209_s13, %s10210_s14  }
  0x75   :  { %10197 = dma.done.wait [#allocation3], 1024  }
  0x76   :  { %10198 = vsyncadd [#allocation3], 4294966272 }
  0x77   :  { %10199 = dma.done.wait [#allocation6], 3072  }
  0x78   :  { %10200 = vsyncadd [#allocation6], 4294964224 }
  0x79   :  { %10201 = dma.done.wait [#allocation9], 1024  }
  0x7a   :  { %10202 = vsyncadd [#allocation9], 4294966272 }
  0x7b   :  { %10203 = dma.done.wait [#allocation12], 1024  }
  0x7c   :  { %10204 = vsyncadd [#allocation12], 4294966272  ;;  %vm158_vm0 = vcmask 261120   ;;  %v154_v0 = vld [vmem:[#allocation8] sm:$0xff]  ;;  %v155_v1 = vld [vmem:[#allocation8 + $0x8] sm:$0xff]  ;;  %vm10217_vm1 = vmmov 0  }
  0x7d   :  { %v156_v2 = vld [vmem:[#allocation8 + $0x10] sm:$0xff]  ;;  %v9845_v3 = vpack.c.bf16 %v155_v1, %v154_v0  ;;  %v157_v4 = vld [vmem:[#allocation8 + $0x18] sm:$0xff]  ;;  %v122_v5 = vld [vmem:[#allocation2] sm:$0xff]  ;;  %vm2426_vm2 = vcmask 64512   ;;  %vm4859_vm3 = vcmask 130048   ;;  %s10218_s6 = smov [#allocation14]  }
  0x7e   :  { %v126_v6 = vld [vmem:[#allocation2 + $0x20] sm:$0xff]  ;;  %v9849_v7 = vpack.c.bf16 %v157_v4, %v156_v2  ;;  %9429 = vmatprep.mubr.msk.f32.mxu0 %vm158_vm0, %v122_v5  ;;  %v289_v9 = vld [vmem:[#allocation10 + $0x8] sm:$0xff]  ;;  %v290_v11 = vld [vmem:[#allocation10 + $0x10] sm:$0xff]  ;;  %v11402_v2 = vmov 0.0   ;;  %s9070_s16 = sshll.u32 %s10218_s6, 4  ;;  %s9071_s16 = int_to_ptr.vmem [resolvable:$true] %s9070_s16 }
  0x7f   :  { %9435 = vmatprep.mubr.msk.f32.mxu1 %vm158_vm0, %v126_v6  ;;  %9846 = vmatprep.subr.bf16.mxu0 %v9845_v3  ;;  %v288_v8 = vld [vmem:[#allocation10] sm:$0xff]  ;;  %v291_v12 = vld [vmem:[#allocation10 + $0x18] sm:$0xff]  ;;  %v123_v13 = vld [vmem:[#allocation2 + $0x8] sm:$0xff]  ;;  %s10175_s3 = scalar_lea.vmem %s9071_s16, 1024  ;;  %p10180_p1 = scmp.lt.s32.totalorder %s9071_s16, %s9071_s16 }
  0x80   :  { %9877 = vmatprep.subr.bf16.mxu1 %v9845_v3  ;;  %9848 = vmatpush3.bf16.msra.mxu0 %v9845_v3  ;;  %v9853_v10 = vpack.c.bf16 %v289_v9, %v288_v8  ;;  %v127_v14 = vld [vmem:[#allocation2 + $0x28] sm:$0xff]  ;;  %v124_v15 = vld [vmem:[#allocation2 + $0x10] sm:$0xff]  ;;  %v9857_v17 = vpack.c.bf16 %v291_v12, %v290_v11  ;;  %v125_v18 = vld [vmem:[#allocation2 + $0x18] sm:$0xff]  ;;  %p10176_p0 = scmp.ne.s32.totalorder %s9071_s16, %s10175_s3  ;;  %p10181_p2 = scmp.lt.s32.totalorder %s10175_s3, %s10175_s3 }
  0x81   :  { %9879 = vmatpush3.bf16.msra.mxu1 %v9845_v3  ;;  %9850 = vmatprep.subr.bf16.mxu0 %v9849_v7  ;;  %v128_v16 = vld [vmem:[#allocation2 + $0x30] sm:$0xff]  ;;  %v129_v19 = vld [vmem:[#allocation2 + $0x38] sm:$0xff]  ;;  %v130_v20 = vld [vmem:[#allocation5] sm:$0xff] }
  0x82   :  { %9878 = vmatprep.subr.bf16.mxu1 %v9849_v7  ;;  %v10395_v21 = vld [vmem:[#allocation5 + $0x8] sm:$0xff]  ;;  %v10397_v22 = vld [vmem:[#allocation5 + $0x10] sm:$0xff]  ;;  %v10403_v23 = vld [vmem:[#allocation5 + $0x18] sm:$0xff]  ;;  %p10182_p3 = por %p10181_p2, %p10180_p1 }
  0x83   :  { %v10405_v24 = vld [vmem:[#allocation5 + $0x20] sm:$0xff]  ;;  %v10411_v25 = vld [vmem:[#allocation5 + $0x28] sm:$0xff]  ;;  %v10413_v26 = vld [vmem:[#allocation5 + $0x30] sm:$0xff] }
  0x84   :  { %9852 = vmatpush3.bf16.msra.mxu0 %v9849_v7  ;;  %v10419_v27 = vld [vmem:[#allocation5 + $0x38] sm:$0xff]  ;;  %v10421_v28 = vld [vmem:[#allocation5 + $0x40] sm:$0xff]  ;;  %v10427_v29 = vld [vmem:[#allocation5 + $0x48] sm:$0xff]  ;;  %p10183_p4 = pnand %p10182_p3, %p10176_p0 }
  0x85   :  { %9880 = vmatpush3.bf16.msra.mxu1 %v9849_v7  ;;  %v10429_v30 = vld [vmem:[#allocation5 + $0x50] sm:$0xff]  ;;  %v10435_v31 = vld [vmem:[#allocation5 + $0x58] sm:$0xff]  ;;  %v10439_v32 = vld [vmem:[#allocation5 + $0x60] sm:$0xff] }
  0x86   :  { %9854 = vmatprep.subr.bf16.mxu1 %v9853_v10  ;;  %v10441_v33 = vld [vmem:[#allocation5 + $0x68] sm:$0xff]  ;;  %v10443_v34 = vld [vmem:[#allocation5 + $0x70] sm:$0xff]  ;;  %v10451_v35 = vld [vmem:[#allocation5 + $0x78] sm:$0xff] }
  0x87   :  { %9430 = vmatmul.mubr.msk.f32.vlgmr.msra.gmra.mrb[0].mxu0 %vm158_vm0, %v123_v13  ;;  %v485_v56 = vld [vmem:[#allocation11] sm:$0xff]  ;;  %v486_v57 = vld [vmem:[#allocation11 + $0x8] sm:$0xff]  ;;  %v487_v59 = vld [vmem:[#allocation11 + $0x10] sm:$0xff] }
  0x88   :  { %9436 = vmatmul.mubr.msk.f32.vlgmr.msra.gmra.mrb[0].mxu1 %vm158_vm0, %v127_v14  ;;  %9432 = vmatprep.mubr.msk.f32.mxu0 %vm158_vm0, %v124_v15  ;;  %v9861_v58 = vpack.c.bf16 %v486_v57, %v485_v56  ;;  %v488_v60 = vld [vmem:[#allocation11 + $0x18] sm:$0xff] }
  0x89   :  { %9438 = vmatprep.mubr.msk.f32.mxu1 %vm158_vm0, %v128_v16  ;;  %9856 = vmatpush3.bf16.msra.mxu1 %v9853_v10  ;;  %v9865_v61 = vpack.c.bf16 %v488_v60, %v487_v59 }
  0x8a   :  { %9858 = vmatprep.subr.bf16.mxu1 %v9857_v17  ;;  %9862 = vmatprep.subr.bf16.mxu0 %v9861_v58 }
  0x8b   :  { %9433 = vmatmul.mubr.msk.f32.gmra.mrb[2].mxu0 %vm158_vm0, %v125_v18 }
  0x8c   :  { %9439 = vmatmul.mubr.msk.f32.gmra.mrb[2].mxu1 %vm158_vm0, %v129_v19  ;;  %9481 = vmatprep.mubr.msk.f32.mxu0 %vm158_vm0, %v130_v20 }
  0x8d   :  { %9449 = vmatprep.mubr.msk.f32.mxu1 %vm158_vm0, %v130_v20  ;;  %9860 = vmatpush3.bf16.msra.mxu1 %v9857_v17 }
  0x8e   :  { %9864 = vmatpush3.bf16.msra.mxu0 %v9861_v58  ;;  %9505 = vmatprep.subr.mxu1 %v11402_v2 }
  0x8f   :  { %9866 = vmatprep.subr.bf16.mxu0 %v9865_v61 }
  0x90   :  { %9450 = vmatmul.mubr.msk.f32.vlgmr.msra.gmra.mrb[4].mxu1 %vm158_vm0, %v10395_v21 }
  0x91   :  { %9452 = vmatprep.mubr.msk.f32.mxu1 %vm158_vm0, %v10397_v22 }
  0x92   :  { %9868 = vmatpush3.bf16.msra.mxu0 %v9865_v61 }
  0x93   :  { %9525 = vmatprep.subr.mxu0 %v11402_v2 }
  0x94   :  { %9453 = vmatmul.mubr.msk.f32.gmra.mrb[6].mxu1 %vm158_vm0, %v10403_v23 }
  0x95   :  { %9455 = vmatprep.mubr.msk.f32.mxu1 %vm158_vm0, %v10405_v24  ;;  %9482 = vmatmul.mubr.msk.f32.vlgmr.msra.gmra.mrb[4].mxu0 %vm158_vm0, %v10395_v21 }
  0x96   :  { %9484 = vmatprep.mubr.msk.f32.mxu0 %vm158_vm0, %v10397_v22 }
  0x98   :  { %9456 = vmatmul.mubr.msk.f32.gmra.mrb[8].mxu1 %vm158_vm0, %v10411_v25 }
  0x99   :  { %9458 = vmatprep.mubr.msk.f32.mxu1 %vm158_vm0, %v10413_v26  ;;  %9485 = vmatmul.mubr.msk.f32.gmra.mrb[6].mxu0 %vm158_vm0, %v10403_v23 }
  0x9a   :  { %9487 = vmatprep.mubr.msk.f32.mxu0 %vm158_vm0, %v10405_v24 }
  0x9c   :  { %9459 = vmatmul.mubr.msk.f32.gmra.mrb[10].mxu1 %vm158_vm0, %v10419_v27 }
  0x9d   :  { %9461 = vmatprep.mubr.msk.f32.mxu1 %vm158_vm0, %v10421_v28  ;;  %9488 = vmatmul.mubr.msk.f32.gmra.mrb[8].mxu0 %vm158_vm0, %v10411_v25 }
  0x9e   :  { %9490 = vmatprep.mubr.msk.f32.mxu0 %vm158_vm0, %v10413_v26 }
  0xa0   :  { %9462 = vmatmul.mubr.msk.f32.gmra.mrb[12].mxu1 %vm158_vm0, %v10427_v29 }
  0xa1   :  { %9464 = vmatprep.mubr.msk.f32.mxu1 %vm158_vm0, %v10429_v30  ;;  %9491 = vmatmul.mubr.msk.f32.gmra.mrb[10].mxu0 %vm158_vm0, %v10419_v27 }
  0xa2   :  { %9493 = vmatprep.mubr.msk.f32.mxu0 %vm158_vm0, %v10421_v28 }
  0xa4   :  { %9465 = vmatmul.mubr.msk.f32.gmra.mrb[14].mxu1 %vm158_vm0, %v10435_v31 }
  0xa5   :  { %9467 = vmatprep.mubr.msk.f32.mxu1 %vm158_vm0, %v10439_v32  ;;  %9494 = vmatmul.mubr.msk.f32.gmra.mrb[12].mxu0 %vm158_vm0, %v10427_v29 }
  0xa6   :  { %9496 = vmatprep.mubr.msk.f32.mxu0 %vm158_vm0, %v10429_v30 }
  0xa8   :  { %9468 = vmatmul.mubr.msk.f32.gmra.mrb[16].mxu1 %vm158_vm0, %v10441_v33 }
  0xa9   :  { %9470 = vmatprep.mubr.msk.f32.mxu1 %vm158_vm0, %v10443_v34  ;;  %9497 = vmatmul.mubr.msk.f32.gmra.mrb[14].mxu0 %vm158_vm0, %v10435_v31 }
  0xaa   :  { %9499 = vmatprep.mubr.msk.f32.mxu0 %vm158_vm0, %v10439_v32 }
  0xac   :  { %9471 = vmatmul.mubr.msk.f32.gmra.mrb[18].mxu1 %vm158_vm0, %v10451_v35 }
  0xad   :  { %9500 = vmatmul.mubr.msk.f32.gmra.mrb[16].mxu0 %vm158_vm0, %v10441_v33  ;;  %9507 = vmatprep.mubr.msk.f32.mxu1 %vm10217_vm1, %v11402_v2 }
  0xae   :  { %9502 = vmatprep.mubr.msk.f32.mxu0 %vm158_vm0, %v10443_v34 }
  0xb1   :  { %9503 = vmatmul.mubr.msk.f32.gmra.mrb[18].mxu0 %vm158_vm0, %v10451_v35 }
  0xb2   :  { %9527 = vmatprep.mubr.msk.f32.mxu0 %vm10217_vm1, %v11402_v2 }
 0x15a   :  { %v9431_v36 = vpop.f32.mrb[0].mxu0 }
 0x15b   :  { %v9437_v37 = vpop.f32.mrb[0].mxu1  ;;  %666 = vxpose.xlu0.b32.start.end [1/1] (short) (narrow) %v9431_v36, 32  ;;  %v249_v39 = vpop.f32.mrb[1].mxu0 }
 0x15c   :  { %v269_v38 = vpop.f32.mrb[1].mxu1 }
 0x15d   :  { %762 = vxpose.xlu1.b32.start.end [1/1] (short) (narrow) %v269_v38, 32 }
 0x15e   :  { %v9434_v40 = vpop.f32.mrb[2].mxu0 }
 0x15f   :  { %v9440_v41 = vpop.f32.mrb[2].mxu1  ;;  %v259_v42 = vpop.f32.mrb[3].mxu0 }
 0x160   :  { %v279_v43 = vpop.f32.mrb[3].mxu1 }
 0x163   :  { %v9451_v44 = vpop.f32.mrb[4].mxu1 }
 0x164   :  { %v406_v45 = vpop.f32.mrb[5].mxu1 }
 0x167   :  { %v9454_v46 = vpop.f32.mrb[6].mxu1 }
 0x168   :  { %794 = vxpose.xlu0.b32.start.end [1/1] (short) (narrow) %v9437_v37, 32  ;;  %v416_v47 = vpop.f32.mrb[7].mxu1  ;;  %v9483_v57 = vpop.f32.mrb[4].mxu0 }
 0x169   :  { %v555_v58 = vpop.f32.mrb[5].mxu0 }
 0x16a   :  { %730 = vxpose.xlu1.b32.start.end [1/1] (short) (narrow) %v9434_v40, 32 }
 0x16b   :  { %v9457_v48 = vpop.f32.mrb[8].mxu1 }
 0x16c   :  { %v426_v49 = vpop.f32.mrb[9].mxu1  ;;  %v9486_v60 = vpop.f32.mrb[6].mxu0 }
 0x16d   :  { %v565_v61 = vpop.f32.mrb[7].mxu0 }
 0x16f   :  { %v9460_v50 = vpop.f32.mrb[10].mxu1 }
 0x170   :  { %v436_v51 = vpop.f32.mrb[11].mxu1 }
 0x173   :  { %v9463_v52 = vpop.f32.mrb[12].mxu1 }
 0x174   :  { %v446_v53 = vpop.f32.mrb[13].mxu1 }
 0x175   :  { %634 = vxpose.xlu0.b32.start.end [1/1] (short) (narrow) %v249_v39, 32 }
 0x177   :  { %698 = vxpose.xlu1.b32.start.end [1/1] (short) (narrow) %v259_v42, 32  ;;  %v10455_v54 = vpop.f32.mrb[14].mxu1 }
 0x178   :  { %v10457_v55 = vpop.f32.mrb[15].mxu1 }
 0x17b   :  { %v10475_v62 = vpop.f32.mrb[16].mxu1 }
 0x17c   :  { %v10477_v63 = vpop.f32.mrb[17].mxu1 }
 0x17f   :  { %v10483_v0 = vpop.f32.mrb[18].mxu1 }
 0x180   :  { %v10485_v1 = vpop.f32.mrb[19].mxu1 }
 0x182   :  { %858 = vxpose.xlu0.b32.start.end [1/1] (short) (narrow) %v9440_v41, 32 }
 0x184   :  { %826 = vxpose.xlu1.b32.start.end [1/1] (short) (narrow) %v279_v43, 32 }
 0x18f   :  { %890 = vxpose.xlu0.b32.start [1/2] (short) (narrow) %v406_v45, 32 }
 0x191   :  { %922 = vxpose.xlu1.b32.start [1/2] (short) (narrow) %v416_v47, 32 }
 0x193   :  { %891 = vxpose.xlu0.b32.end [2/2] (short) (narrow) %v9451_v44, 32 }
 0x195   :  { %923 = vxpose.xlu1.b32.end [2/2] (short) (narrow) %v9454_v46, 32 }
 0x19c   :  { %986 = vxpose.xlu0.b32.start [1/2] (short) (narrow) %v436_v51, 32 }
 0x19e   :  { %954 = vxpose.xlu1.b32.start [1/2] (short) (narrow) %v426_v49, 32 }
 0x1a0   :  { %987 = vxpose.xlu0.b32.end [2/2] (short) (narrow) %v9460_v50, 32 }
 0x1a2   :  { %955 = vxpose.xlu1.b32.end [2/2] (short) (narrow) %v9457_v48, 32 }
 0x1ab   :  { %1018 = vxpose.xlu1.b32.start [1/2] (short) (narrow) %v446_v53, 32 }
 0x1af   :  { %1019 = vxpose.xlu1.b32.end [2/2] (short) (narrow) %v9463_v52, 32 }
 0x1db   :  { %v682_v3 = vpop.trf.xlu0 }
 0x1dc   :  { %1530 = vxpose.xlu1.b32.start.end [1/1] (short) (narrow) %v682_v3, 8 }
 0x1dd   :  { %v778_v4 = vpop.trf.xlu1 }
 0x1de   :  { %1914 = vxpose.xlu0.b32.start.end [1/1] (short) (narrow) %v778_v4, 8 }
 0x1df   :  { %v683_v5 = vpop.trf.xlu0 }
 0x1e1   :  { %v779_v6 = vpop.trf.xlu1 }
 0x1e2   :  { %1562 = vxpose.xlu0.b32.start.end [1/1] (short) (narrow) %v683_v5, 8 }
 0x1e3   :  { %v684_v7 = vpop.trf.xlu0 }
 0x1e5   :  { %v780_v8 = vpop.trf.xlu1 }
 0x1e7   :  { %v685_v9 = vpop.trf.xlu0 }
 0x1e9   :  { %v781_v10 = vpop.trf.xlu1 }
 0x1eb   :  { %v810_v11 = vpop.trf.xlu0 }
 0x1ed   :  { %v746_v12 = vpop.trf.xlu1 }
 0x1ef   :  { %v811_v13 = vpop.trf.xlu0 }
 0x1f1   :  { %v747_v14 = vpop.trf.xlu1 }
 0x1f3   :  { %v812_v15 = vpop.trf.xlu0 }
 0x1f5   :  { %v748_v16 = vpop.trf.xlu1 }
 0x1f7   :  { %v813_v17 = vpop.trf.xlu0 }
 0x1f9   :  { %v749_v18 = vpop.trf.xlu1 }
 0x1fb   :  { %v650_v19 = vpop.trf.xlu0 }
 0x1fc   :  { %1402 = vxpose.xlu1.b32.start.end [1/1] (short) (narrow) %v650_v19, 8 }
 0x1fd   :  { %v714_v20 = vpop.trf.xlu1 }
 0x1ff   :  { %v651_v21 = vpop.trf.xlu0 }
 0x200   :  { %1434 = vxpose.xlu0.b32.start.end [1/1] (short) (narrow) %v651_v21, 8  ;;  %1786 = vxpose.xlu1.b32.start.end [1/1] (short) (narrow) %v746_v12, 8 }
 0x201   :  { %v715_v22 = vpop.trf.xlu1 }
 0x203   :  { %v652_v23 = vpop.trf.xlu0 }
 0x204   :  { %1818 = vxpose.xlu1.b32.start.end [1/1] (short) (narrow) %v747_v14, 8  ;;  %1658 = vxpose.xlu0.b32.start.end [1/1] (short) (narrow) %v714_v20, 8 }
 0x205   :  { %v716_v24 = vpop.trf.xlu1 }
 0x207   :  { %v653_v25 = vpop.trf.xlu0 }
 0x208   :  { %1466 = vxpose.xlu1.b32.start.end [1/1] (short) (narrow) %v652_v23, 8  ;;  %1594 = vxpose.xlu0.b32.start.end [1/1] (short) (narrow) %v684_v7, 8 }
 0x209   :  { %v717_v26 = vpop.trf.xlu1 }
 0x20b   :  { %v874_v27 = vpop.trf.xlu0 }
 0x20c   :  { %1946 = vxpose.xlu1.b32.start.end [1/1] (short) (narrow) %v779_v6, 8  ;;  %1690 = vxpose.xlu0.b32.start.end [1/1] (short) (narrow) %v715_v22, 8 }
 0x20d   :  { %v842_v28 = vpop.trf.xlu1 }
 0x20f   :  { %v875_v29 = vpop.trf.xlu0 }
 0x210   :  { %1850 = vxpose.xlu1.b32.start.end [1/1] (short) (narrow) %v748_v16, 8  ;;  %1626 = vxpose.xlu0.b32.start.end [1/1] (short) (narrow) %v685_v9, 8 }
 0x211   :  { %v843_v30 = vpop.trf.xlu1 }
 0x213   :  { %v876_v31 = vpop.trf.xlu0 }
 0x214   :  { %1498 = vxpose.xlu0.b32.start.end [1/1] (short) (narrow) %v653_v25, 8  ;;  %1754 = vxpose.xlu1.b32.start.end [1/1] (short) (narrow) %v717_v26, 8 }
 0x215   :  { %v844_v32 = vpop.trf.xlu1 }
 0x217   :  { %v877_v33 = vpop.trf.xlu0 }
 0x218   :  { %1978 = vxpose.xlu0.b32.start.end [1/1] (short) (narrow) %v780_v8, 8  ;;  %1050 = vxpose.xlu1.b32.start [1/2] (short) (narrow) %v10457_v55, 32 }
 0x219   :  { %v845_v34 = vpop.trf.xlu1 }
 0x21b   :  { %v906_v35 = vpop.trf.xlu0 }
 0x21c   :  { %1722 = vxpose.xlu0.b32.start.end [1/1] (short) (narrow) %v716_v24, 8  ;;  %1051 = vxpose.xlu1.b32.end [2/2] (short) (narrow) %v10455_v54, 32 }
 0x21d   :  { %v938_v36 = vpop.trf.xlu1  ;;  %9506 = vmatpush3.msra.mxu1 %v906_v35 }
 0x21e   :  { %9526 = vmatpush3.msra.mxu0 %v938_v36  ;;  %9510 = vmatprep.subr.mxu1 %v11402_v2 }
 0x21f   :  { %9535 = vmatprep.subr.mxu0 %v11402_v2  ;;  %v907_v46 = vpop.trf.xlu0 }
 0x220   :  { %2010 = vxpose.xlu0.b32.start.end [1/1] (short) (narrow) %v781_v10, 8 }
 0x221   :  { %v10507_v37 = vpop.trf.xlu1 }
 0x223   :  { %v908_v48 = vpop.trf.xlu0 }
 0x224   :  { %1882 = vxpose.xlu0.b32.start.end [1/1] (short) (narrow) %v749_v18, 8 }
 0x225   :  { %v940_v38 = vpop.trf.xlu1  ;;  %2106 = vxpose.xlu1.b32.start.end [1/1] (short) (narrow) %v812_v15, 8 }
 0x227   :  { %v909_v50 = vpop.trf.xlu0 }
 0x228   :  { %2042 = vxpose.xlu0.b32.start.end [1/1] (short) (narrow) %v810_v11, 8 }
 0x229   :  { %v10509_v39 = vpop.trf.xlu1  ;;  %2170 = vxpose.xlu1.b32.start.end [1/1] (short) (narrow) %v842_v28, 8 }
 0x22b   :  { %v10531_v52 = vpop.trf.xlu0 }
 0x22c   :  { %2074 = vxpose.xlu0.b32.start.end [1/1] (short) (narrow) %v811_v13, 8 }
 0x22d   :  { %v10511_v40 = vpop.trf.xlu1  ;;  %2202 = vxpose.xlu1.b32.start.end [1/1] (short) (narrow) %v843_v30, 8 }
 0x22f   :  { %v10537_v53 = vpop.trf.xlu0 }
 0x230   :  { %2138 = vxpose.xlu0.b32.start.end [1/1] (short) (narrow) %v813_v17, 8 }
 0x231   :  { %2266 = vxpose.xlu1.b32.start.end [1/1] (short) (narrow) %v845_v34, 8  ;;  %v10513_v41 = vpop.trf.xlu1 }
 0x233   :  { %v10539_v54 = vpop.trf.xlu0 }
 0x234   :  { %1082 = vxpose.xlu0.b32.start [1/2] (short) (narrow) %v10477_v63, 32  ;;  %v9489_v63 = vpop.f32.mrb[8].mxu0 }
 0x235   :  { %1114 = vxpose.xlu1.b32.start [1/2] (short) (narrow) %v10485_v1, 32  ;;  %v10518_v42 = vpop.trf.xlu1 }
 0x237   :  { %v10541_v55 = vpop.trf.xlu0 }
 0x238   :  { %1083 = vxpose.xlu0.b32.end [2/2] (short) (narrow) %v10475_v62, 32 }
 0x239   :  { %1115 = vxpose.xlu1.b32.end [2/2] (short) (narrow) %v10483_v0, 32  ;;  %v10521_v43 = vpop.trf.xlu1  ;;  %v575_v0 = vpop.f32.mrb[9].mxu0 }
 0x23a   :  { %v9492_v4 = vpop.f32.mrb[10].mxu0 }
 0x23b   :  { %v585_v5 = vpop.f32.mrb[11].mxu0 }
 0x23c   :  { %v10557_v8 = vpop.f32.mrb[12].mxu0 }
 0x23d   :  { %v10523_v44 = vpop.trf.xlu1  ;;  %v10559_v9 = vpop.f32.mrb[13].mxu0 }
 0x23e   :  { %v10564_v12 = vpop.f32.mrb[14].mxu0 }
 0x23f   :  { %v10569_v13 = vpop.f32.mrb[15].mxu0 }
 0x240   :  { %v10580_v16 = vpop.f32.mrb[16].mxu0 }
 0x241   :  { %2234 = vxpose.xlu0.b32.start.end [1/1] (short) (narrow) %v844_v32, 8  ;;  %v10525_v45 = vpop.trf.xlu1  ;;  %v10583_v17 = vpop.f32.mrb[17].mxu0 }
 0x242   :  { %2362 = vxpose.xlu1.b32.start.end [1/1] (short) (narrow) %v876_v31, 8  ;;  %v10585_v20 = vpop.f32.mrb[18].mxu0 }
 0x243   :  { %v10587_v21 = vpop.f32.mrb[19].mxu0 }
 0x245   :  { %2298 = vxpose.xlu0.b32.start.end [1/1] (short) (narrow) %v874_v27, 8  ;;  %v10527_v47 = vpop.trf.xlu1 }
 0x246   :  { %1146 = vxpose.xlu1.b32.start [1/2] (short) (narrow) %v555_v58, 32 }
 0x249   :  { %2330 = vxpose.xlu0.b32.start.end [1/1] (short) (narrow) %v875_v29, 8  ;;  %v10529_v49 = vpop.trf.xlu1 }
 0x24a   :  { %1147 = vxpose.xlu1.b32.end [2/2] (short) (narrow) %v9483_v57, 32 }
 0x24d   :  { %2394 = vxpose.xlu0.b32.start.end [1/1] (short) (narrow) %v877_v33, 8 }
 0x251   :  { %1178 = vxpose.xlu0.b32.start [1/2] (short) (narrow) %v565_v61, 32  ;;  %v146_v61 = vld [vmem:[#allocation7] sm:$0xff] }
 0x253   :  { %1210 = vxpose.xlu1.b32.start [1/2] (short) (narrow) %v575_v0, 32 }
 0x255   :  { %1179 = vxpose.xlu0.b32.end [2/2] (short) (narrow) %v9486_v60, 32 }
 0x257   :  { %1211 = vxpose.xlu1.b32.end [2/2] (short) (narrow) %v9489_v63, 32 }
 0x25c   :  { %v1546_v51 = vpop.trf.xlu1 }
 0x25d   :  { %9528 = vmatmul.mubr.msk.f32.vlgmr.msra.gmra.mrb[20].mxu0 %vm2426_vm2, %v1546_v51 }
 0x25e   :  { %9536 = vmatpush3.msra.mxu0 %v940_v38  ;;  %9537 = vmatprep.mubr.msk.f32.mxu0 %vm10217_vm1, %v11402_v2  ;;  %v10543_v56 = vpop.trf.xlu0 }
 0x25f   :  { %9545 = vmatprep.subr.mxu0 %v11402_v2  ;;  %1242 = vxpose.xlu0.b32.start [1/2] (short) (narrow) %v585_v5, 32 }
 0x262   :  { %v1578_v59 = vpop.trf.xlu0 }
 0x263   :  { %1243 = vxpose.xlu0.b32.end [2/2] (short) (narrow) %v9492_v4, 32 }
 0x27c   :  { %v1418_v62 = vpop.trf.xlu1 }
 0x27d   :  { %9508 = vmatmul.mubr.msk.f32.vlgmr.msra.gmra.mrb[20].mxu1 %vm2426_vm2, %v1418_v62 }
 0x27e   :  { %9511 = vmatpush3.msra.mxu1 %v907_v46  ;;  %9512 = vmatprep.mubr.msk.f32.mxu1 %vm10217_vm1, %v11402_v2 }
 0x27f   :  { %9515 = vmatprep.subr.mxu1 %v11402_v2 }
 0x280   :  { %v1450_v1 = vpop.trf.xlu0  ;;  %v10549_v3 = vpop.trf.xlu1 }
 0x281   :  { %9513 = vmatmul.mubr.msk.f32.vlgmr.msra.gmra.mrb[22].mxu1 %vm2426_vm2, %v1450_v1 }
 0x282   :  { %9516 = vmatpush3.msra.mxu1 %v908_v48  ;;  %9517 = vmatprep.mubr.msk.f32.mxu1 %vm10217_vm1, %v11402_v2 }
 0x283   :  { %9520 = vmatprep.subr.mxu1 %v11402_v2 }
 0x284   :  { %v1674_v6 = vpop.trf.xlu0  ;;  %v10555_v7 = vpop.trf.xlu1 }
 0x288   :  { %v1610_v10 = vpop.trf.xlu0  ;;  %v1482_v11 = vpop.trf.xlu1 }
 0x289   :  { %9518 = vmatmul.mubr.msk.f32.vlgmr.msra.gmra.mrb[24].mxu1 %vm2426_vm2, %v1482_v11  ;;  %9538 = vmatmul.mubr.msk.f32.vlgmr.msra.gmra.mrb[22].mxu0 %vm2426_vm2, %v1610_v10 }
 0x28a   :  { %9521 = vmatpush3.msra.mxu1 %v909_v50  ;;  %9546 = vmatpush3.msra.mxu0 %v10511_v40 }
 0x28b   :  { %9547 = vmatprep.mubr.msk.f32.mxu0 %vm10217_vm1, %v11402_v2  ;;  %9555 = vmatprep.subr.mxu0 %v11402_v2 }
 0x28c   :  { %v1706_v14 = vpop.trf.xlu0  ;;  %v10571_v15 = vpop.trf.xlu1  ;;  %9522 = vmatprep.mubr.msk.f32.mxu1 %vm10217_vm1, %v11402_v2  ;;  %9530 = vmatprep.subr.mxu1 %v11402_v2 }
 0x28d   :  { %9548 = vmatmul.mubr.msk.f32.vlgmr.msra.gmra.mrb[24].mxu0 %vm2426_vm2, %v1674_v6 }
 0x28e   :  { %9556 = vmatpush3.msra.mxu0 %v10518_v42  ;;  %9557 = vmatprep.mubr.msk.f32.mxu0 %vm10217_vm1, %v11402_v2 }
 0x28f   :  { %9565 = vmatprep.subr.mxu0 %v11402_v2 }
 0x290   :  { %v1642_v18 = vpop.trf.xlu0  ;;  %v1866_v19 = vpop.trf.xlu1 }
 0x294   :  { %v1514_v22 = vpop.trf.xlu0  ;;  %v1770_v23 = vpop.trf.xlu1 }
 0x295   :  { %9523 = vmatmul.mubr.msk.f32.vlgmr.msra.gmra.mrb[26].mxu1 %vm2426_vm2, %v1514_v22 }
 0x296   :  { %9531 = vmatpush3.msra.mxu1 %v10507_v37  ;;  %9532 = vmatprep.mubr.msk.f32.mxu1 %vm10217_vm1, %v11402_v2 }
 0x297   :  { %9540 = vmatprep.subr.mxu1 %v11402_v2 }
 0x298   :  { %v1994_v24 = vpop.trf.xlu0  ;;  %v1066_v25 = vpop.trf.xlu1 }
 0x299   :  { %9533 = vmatmul.mubr.msk.f32.vlgmr.msra.gmra.mrb[28].mxu1 %vm2426_vm2, %v1578_v59 }
 0x29a   :  { %9541 = vmatpush3.msra.mxu1 %v10509_v39  ;;  %9542 = vmatprep.mubr.msk.f32.mxu1 %vm10217_vm1, %v11402_v2 }
 0x29b   :  { %9550 = vmatprep.subr.mxu1 %v11402_v2 }
 0x29c   :  { %v1738_v26 = vpop.trf.xlu0  ;;  %v10599_v27 = vpop.trf.xlu1 }
 0x29d   :  { %9543 = vmatmul.mubr.msk.f32.vlgmr.msra.gmra.mrb[30].mxu1 %vm2426_vm2, %v1642_v18  ;;  %9558 = vmatmul.mubr.msk.f32.vlgmr.msra.gmra.mrb[26].mxu0 %vm2426_vm2, %v1738_v26 }
 0x29e   :  { %9551 = vmatpush3.msra.mxu1 %v10513_v41  ;;  %9566 = vmatpush3.msra.mxu0 %v10531_v52 }
 0x29f   :  { %9552 = vmatprep.mubr.msk.f32.mxu1 %vm10217_vm1, %v11402_v2  ;;  %9560 = vmatprep.subr.mxu1 %v11402_v2 }
 0x2a0   :  { %v2026_v28 = vpop.trf.xlu0  ;;  %9567 = vmatprep.mubr.msk.f32.mxu0 %vm10217_vm1, %v11402_v2  ;;  %9575 = vmatprep.subr.mxu0 %v11402_v2  ;;  %v1068_v29 = vpop.trf.xlu1 }
 0x2a1   :  { %9553 = vmatmul.mubr.msk.f32.vlgmr.msra.gmra.mrb[32].mxu1 %vm2426_vm2, %v1706_v14  ;;  %9568 = vmatmul.mubr.msk.f32.vlgmr.msra.gmra.mrb[28].mxu0 %vm2426_vm2, %v10549_v3 }
 0x2a2   :  { %9561 = vmatpush3.msra.mxu1 %v10521_v43  ;;  %9576 = vmatpush3.msra.mxu0 %v10539_v54  ;;  %v10714_v54 = vld [vmem:[#allocation7 + $0x8] sm:$0xff] }
 0x2a3   :  { %9562 = vmatprep.mubr.msk.f32.mxu1 %vm10217_vm1, %v11402_v2  ;;  %9570 = vmatprep.subr.mxu1 %v11402_v2 }
 0x2a4   :  { %v1898_v30 = vpop.trf.xlu0  ;;  %9577 = vmatprep.mubr.msk.f32.mxu0 %vm10217_vm1, %v11402_v2  ;;  %9585 = vmatprep.subr.mxu0 %v11402_v2  ;;  %v1069_v31 = vpop.trf.xlu1 }
 0x2a5   :  { %9563 = vmatmul.mubr.msk.f32.vlgmr.msra.gmra.mrb[34].mxu1 %vm2426_vm2, %v1770_v23  ;;  %9578 = vmatmul.mubr.msk.f32.vlgmr.msra.gmra.mrb[30].mxu0 %vm2426_vm2, %v1866_v19 }
 0x2a6   :  { %9571 = vmatpush3.msra.mxu1 %v10537_v53  ;;  %9586 = vmatpush3.msra.mxu0 %v10523_v44 }
 0x2a7   :  { %9572 = vmatprep.mubr.msk.f32.mxu1 %vm10217_vm1, %v11402_v2  ;;  %9580 = vmatprep.subr.mxu1 %v11402_v2 }
 0x2a8   :  { %v2058_v32 = vpop.trf.xlu0  ;;  %9587 = vmatprep.mubr.msk.f32.mxu0 %vm10217_vm1, %v11402_v2  ;;  %9595 = vmatprep.subr.mxu0 %v11402_v2  ;;  %v2122_v33 = vpop.trf.xlu1 }
 0x2a9   :  { %9573 = vmatmul.mubr.msk.f32.vlgmr.msra.gmra.mrb[36].mxu1 %vm2426_vm2, %v10555_v7  ;;  %9588 = vmatmul.mubr.msk.f32.vlgmr.msra.gmra.mrb[32].mxu0 %vm2426_vm2, %v10543_v56 }
 0x2aa   :  { %9581 = vmatpush3.msra.mxu1 %v10541_v55  ;;  %9596 = vmatpush3.msra.mxu0 %v10527_v47 }
 0x2ab   :  { %9582 = vmatprep.mubr.msk.f32.mxu1 %vm10217_vm1, %v11402_v2  ;;  %9590 = vmatprep.subr.mxu1 %v11402_v2 }
 0x2ac   :  { %v2090_v34 = vpop.trf.xlu0  ;;  %9597 = vmatprep.mubr.msk.f32.mxu0 %vm10217_vm1, %v11402_v2  ;;  %9605 = vmatprep.subr.mxu0 %v11402_v2  ;;  %v2186_v35 = vpop.trf.xlu1 }
 0x2ad   :  { %9583 = vmatmul.mubr.msk.f32.vlgmr.msra.gmra.mrb[38].mxu1 %vm2426_vm2, %v1898_v30  ;;  %9598 = vmatmul.mubr.msk.f32.vlgmr.msra.gmra.mrb[34].mxu0 %vm2426_vm2, %v1994_v24 }
 0x2ae   :  { %9591 = vmatpush3.msra.mxu1 %v10525_v45  ;;  %9606 = vmatpush3.msra.mxu0 %v1066_v25 }
 0x2af   :  { %9592 = vmatprep.mubr.msk.f32.mxu1 %vm10217_vm1, %v11402_v2  ;;  %9600 = vmatprep.subr.mxu1 %v11402_v2 }
 0x2b0   :  { %v2154_v36 = vpop.trf.xlu0  ;;  %9607 = vmatprep.mubr.msk.f32.mxu0 %vm10217_vm1, %v11402_v2  ;;  %9615 = vmatprep.subr.mxu0 %v11402_v2  ;;  %v2218_v37 = vpop.trf.xlu1 }
 0x2b1   :  { %9593 = vmatmul.mubr.msk.f32.vlgmr.msra.gmra.mrb[40].mxu1 %vm2426_vm2, %v10571_v15  ;;  %9608 = vmatmul.mubr.msk.f32.vlgmr.msra.gmra.mrb[36].mxu0 %vm2426_vm2, %v2058_v32 }
 0x2b2   :  { %9601 = vmatpush3.msra.mxu1 %v10529_v49  ;;  %9616 = vmatpush3.msra.mxu0 %v1068_v29 }
 0x2b3   :  { %9602 = vmatprep.mubr.msk.f32.mxu1 %vm10217_vm1, %v11402_v2  ;;  %9610 = vmatprep.subr.mxu1 %v11402_v2 }
 0x2b4   :  { %v1098_v38 = vpop.trf.xlu0  ;;  %9617 = vmatprep.mubr.msk.f32.mxu0 %vm10217_vm1, %v11402_v2  ;;  %9625 = vmatprep.subr.mxu0 %v11402_v2  ;;  %v2282_v39 = vpop.trf.xlu1 }
 0x2b5   :  { %9603 = vmatmul.mubr.msk.f32.vlgmr.msra.gmra.mrb[42].mxu1 %vm2426_vm2, %v2026_v28  ;;  %9618 = vmatmul.mubr.msk.f32.vlgmr.msra.gmra.mrb[38].mxu0 %vm2426_vm2, %v2122_v33 }
 0x2b6   :  { %9611 = vmatpush3.msra.mxu1 %v10599_v27  ;;  %9626 = vmatpush3.msra.mxu0 %v1098_v38  ;;  %v148_v27 = vld [vmem:[#allocation7 + $0x10] sm:$0xff] }
 0x2b7   :  { %9612 = vmatprep.mubr.msk.f32.mxu1 %vm10217_vm1, %v11402_v2  ;;  %9620 = vmatprep.subr.mxu1 %v11402_v2 }
 0x2b8   :  { %v1099_v40 = vpop.trf.xlu0  ;;  %9627 = vmatprep.mubr.msk.f32.mxu0 %vm10217_vm1, %v11402_v2  ;;  %9635 = vmatprep.subr.mxu0 %v11402_v2  ;;  %v1130_v41 = vpop.trf.xlu1 }
 0x2b9   :  { %9613 = vmatmul.mubr.msk.f32.vlgmr.msra.gmra.mrb[44].mxu1 %vm2426_vm2, %v2090_v34  ;;  %9628 = vmatmul.mubr.msk.f32.vlgmr.msra.gmra.mrb[40].mxu0 %vm2426_vm2, %v2186_v35 }
 0x2ba   :  { %9621 = vmatpush3.msra.mxu1 %v1069_v31  ;;  %9622 = vmatprep.mubr.msk.f32.mxu1 %vm10217_vm1, %v11402_v2 }
 0x2bb   :  { %9630 = vmatprep.subr.mxu1 %v11402_v2  ;;  %9637 = vmatprep.mubr.msk.f32.mxu0 %vm10217_vm1, %v11402_v2 }
 0x2bc   :  { %v1100_v42 = vpop.trf.xlu0  ;;  %v1131_v43 = vpop.trf.xlu1 }
 0x2bd   :  { %9623 = vmatmul.mubr.msk.f32.vlgmr.msra.gmra.mrb[46].mxu1 %vm2426_vm2, %v2154_v36  ;;  %9636 = vmatpush3.msra.mxu0 %v1100_v42 }
 0x2be   :  { %9631 = vmatpush3.msra.mxu1 %v1099_v40  ;;  %9632 = vmatprep.mubr.msk.f32.mxu1 %vm10217_vm1, %v11402_v2 }
 0x2bf   :  { %9640 = vmatprep.subr.mxu1 %v11402_v2  ;;  %9645 = vmatprep.subr.mxu0 %v11402_v2 }
 0x2c0   :  { %v1101_v44 = vpop.trf.xlu0  ;;  %v1132_v45 = vpop.trf.xlu1 }
 0x2c1   :  { %9633 = vmatmul.mubr.msk.f32.vlgmr.msra.gmra.mrb[48].mxu1 %vm2426_vm2, %v2218_v37 }
 0x2c2   :  { %9641 = vmatpush3.msra.mxu1 %v1101_v44  ;;  %9642 = vmatprep.mubr.msk.f32.mxu1 %vm10217_vm1, %v11402_v2 }
 0x2c3   :  { %9650 = vmatprep.subr.mxu1 %v11402_v2 }
 0x2c4   :  { %v2250_v46 = vpop.trf.xlu0  ;;  %v1133_v47 = vpop.trf.xlu1 }
 0x2c5   :  { %9638 = vmatmul.mubr.msk.f32.vlgmr.msra.gmra.mrb[42].mxu0 %vm2426_vm2, %v2250_v46  ;;  %9643 = vmatmul.mubr.msk.f32.vlgmr.msra.gmra.mrb[50].mxu1 %vm2426_vm2, %v2282_v39 }
 0x2c6   :  { %9646 = vmatpush3.msra.mxu0 %v1130_v41  ;;  %9651 = vmatpush3.msra.mxu1 %v1131_v43 }
 0x2c7   :  { %9647 = vmatprep.mubr.msk.f32.mxu0 %vm10217_vm1, %v11402_v2  ;;  %9655 = vmatprep.subr.mxu0 %v11402_v2 }
 0x2c8   :  { %v2314_v48 = vpop.trf.xlu0  ;;  %9652 = vmatprep.mubr.msk.f32.mxu1 %vm10217_vm1, %v11402_v2  ;;  %9660 = vmatprep.subr.mxu1 %v11402_v2  ;;  %v2378_v49 = vpop.trf.xlu1 }
 0x2c9   :  { %9648 = vmatmul.mubr.msk.f32.vlgmr.msra.gmra.mrb[44].mxu0 %vm2426_vm2, %v2314_v48 }
 0x2ca   :  { %9656 = vmatpush3.msra.mxu0 %v1132_v45  ;;  %9657 = vmatprep.mubr.msk.f32.mxu0 %vm10217_vm1, %v11402_v2 }
 0x2cb   :  { %9665 = vmatprep.subr.mxu0 %v11402_v2 }
 0x2cc   :  { %v2346_v50 = vpop.trf.xlu0  ;;  %v1162_v52 = vpop.trf.xlu1 }
 0x2cd   :  { %9653 = vmatmul.mubr.msk.f32.vlgmr.msra.gmra.mrb[52].mxu1 %vm2426_vm2, %v2346_v50  ;;  %9658 = vmatmul.mubr.msk.f32.vlgmr.msra.gmra.mrb[46].mxu0 %vm2426_vm2, %v2378_v49 }
 0x2ce   :  { %9661 = vmatpush3.msra.mxu1 %v1133_v47  ;;  %9662 = vmatprep.mubr.msk.f32.mxu1 %vm10217_vm1, %v11402_v2 }
 0x2cf   :  { %9670 = vmatprep.subr.mxu1 %v11402_v2  ;;  %9667 = vmatprep.mubr.msk.f32.mxu0 %vm10217_vm1, %v11402_v2 }
 0x2d0   :  { %v2410_v51 = vpop.trf.xlu0  ;;  %v1163_v53 = vpop.trf.xlu1 }
 0x2d1   :  { %9663 = vmatmul.mubr.msk.f32.vlgmr.msra.gmra.mrb[54].mxu1 %vm2426_vm2, %v2410_v51  ;;  %9666 = vmatpush3.xpose.msk.msra.mxu0 %vm4859_vm3, %v1162_v52 }
 0x2d2   :  { %9672 = vmatprep.mubr.msk.f32.mxu1 %vm10217_vm1, %v11402_v2  ;;  %9675 = vmatprep.subr.mxu0 %v11402_v2 }
 0x2d5   :  { %9671 = vmatpush3.xpose.msk.msra.mxu1 %vm4859_vm3, %v1163_v53 }
 0x2d6   :  { %9680 = vmatprep.subr.mxu1 %v11402_v2 }
 0x330   :  { %v2788_v55 = vpop.f32.mrb[20].mxu0 }
 0x331   :  { %v4767_v56 = vmul.f32 0.35355338, %v2788_v55  ;;  %v9529_v57 = vpop.f32.mrb[21].mxu0 }
 0x333   :  { %v10717_v58 = vadd.f32 %v4767_v56, %v10714_v54 }
 0x335   :  { %v4831_v59 = vmax.f32 %v10717_v58, -3.4028235e+38 }
 0x337   :  { %v4872_v60 = vsel %vm4859_vm3, %v4831_v59, -inf }
 0x338   :  { %4873 = vmax.xlane.f32.xlu1 %v4872_v60 }
 0x350   :  { %v2496_v62 = vpop.f32.mrb[20].mxu1 }
 0x351   :  { %v4763_v63 = vmul.f32 0.35355338, %v2496_v62  ;;  %v9509_v0 = vpop.f32.mrb[21].mxu1  ;;  %v149_v62 = vld [vmem:[#allocation7 + $0x18] sm:$0xff] }
 0x353   :  { %v10723_v1 = vadd.f32 %v4763_v63, %v146_v61 }
 0x354   :  { %v2569_v3 = vpop.f32.mrb[22].mxu1 }
 0x355   :  { %v4827_v4 = vmax.f32 %v10723_v1, -3.4028235e+38  ;;  %v4764_v5 = vmul.f32 0.35355338, %v2569_v3  ;;  %v9514_v6 = vpop.f32.mrb[23].mxu1 }
 0x357   :  { %v10726_v7 = vadd.f32 %v4764_v5, %v146_v61  ;;  %v4860_v10 = vsel %vm4859_vm3, %v4827_v4, -inf }
 0x358   :  { %4861 = vmax.xlane.f32.xlu0 %v4860_v10 }
 0x359   :  { %v4828_v11 = vmax.f32 %v10726_v7, -3.4028235e+38 }
 0x35b   :  { %v4863_v14 = vsel %vm4859_vm3, %v4828_v11, -inf }
 0x35c   :  { %4864 = vmax.xlane.f32.xlu1 %v4863_v14  ;;  %v2934_v15 = vpop.f32.mrb[22].mxu0  ;;  %v2642_v18 = vpop.f32.mrb[24].mxu1 }
 0x35d   :  { %v4769_v19 = vmul.f32 0.35355338, %v2934_v15  ;;  %v9539_v22 = vpop.f32.mrb[23].mxu0  ;;  %v4765_v23 = vmul.f32 0.35355338, %v2642_v18  ;;  %v9519_v24 = vpop.f32.mrb[25].mxu1 }
 0x35f   :  { %v10736_v25 = vadd.f32 %v4769_v19, %v10714_v54  ;;  %v10738_v26 = vadd.f32 %v4765_v23, %v146_v61 }
 0x360   :  { %v3080_v28 = vpop.f32.mrb[24].mxu0 }
 0x361   :  { %v11432_v29 = vmax.f32 %v10736_v25, -3.4028235e+38  ;;  %v11430_v30 = vmax.f32 %v10738_v26, -3.4028235e+38  ;;  %v4771_v31 = vmul.f32 0.35355338, %v3080_v28 }
 0x362   :  { %v9549_v32 = vpop.f32.mrb[25].mxu0 }
 0x363   :  { %v10742_v33 = vadd.f32 %v4771_v31, %v148_v27  ;;  %v4878_v34 = vsel %vm4859_vm3, %v11432_v29, -inf  ;;  %v4866_v35 = vsel %vm4859_vm3, %v11430_v30, -inf }
 0x364   :  { %4879 = vmax.xlane.f32.xlu1 %v4878_v34 }
 0x365   :  { %v11428_v36 = vmax.f32 %v10742_v33, -3.4028235e+38 }
 0x367   :  { %v4884_v41 = vsel %vm4859_vm3, %v11428_v36, -inf }
 0x368   :  { %v2715_v37 = vpop.f32.mrb[26].mxu1  ;;  %4867 = vmax.xlane.f32.xlu1 %v4866_v35 }
 0x369   :  { %v4766_v38 = vmul.f32 0.35355338, %v2715_v37  ;;  %v9524_v39 = vpop.f32.mrb[27].mxu1 }
 0x36b   :  { %v10751_v40 = vadd.f32 %v4766_v38, %v146_v61 }
 0x36c   :  { %v2861_v42 = vpop.f32.mrb[28].mxu1  ;;  %4885 = vmax.xlane.f32.xlu1 %v4884_v41 }
 0x36d   :  { %v11431_v43 = vmax.f32 %v10751_v40, -3.4028235e+38  ;;  %v4768_v44 = vmul.f32 0.35355338, %v2861_v42  ;;  %v9534_v45 = vpop.f32.mrb[29].mxu1 }
 0x36f   :  { %v10758_v46 = vadd.f32 %v4768_v44, %v10714_v54  ;;  %v4869_v47 = vsel %vm4859_vm3, %v11431_v43, -inf  ;;  %v150_v44 = vld [vmem:[#allocation7 + $0x20] sm:$0xff] }
 0x370   :  { %v3007_v48 = vpop.f32.mrb[30].mxu1  ;;  %4870 = vmax.xlane.f32.xlu0 %v4869_v47  ;;  %v3226_v49 = vpop.f32.mrb[26].mxu0 }
 0x371   :  { %v11429_v50 = vmax.f32 %v10758_v46, -3.4028235e+38  ;;  %v4770_v51 = vmul.f32 0.35355338, %v3007_v48  ;;  %v4773_v52 = vmul.f32 0.35355338, %v3226_v49 }
 0x372   :  { %v9544_v53 = vpop.f32.mrb[31].mxu1  ;;  %v9559_v55 = vpop.f32.mrb[27].mxu0 }
 0x373   :  { %v10765_v56 = vadd.f32 %v4770_v51, %v10714_v54  ;;  %v10767_v57 = vadd.f32 %v4773_v52, %v148_v27  ;;  %v4875_v60 = vsel %vm4859_vm3, %v11429_v50, -inf }
 0x374   :  { %v3153_v61 = vpop.f32.mrb[32].mxu1  ;;  %4876 = vmax.xlane.f32.xlu0 %v4875_v60  ;;  %v3372_v63 = vpop.f32.mrb[28].mxu0 }
 0x375   :  { %v11427_v0 = vmax.f32 %v10765_v56, -3.4028235e+38  ;;  %v11426_v3 = vmax.f32 %v10767_v57, -3.4028235e+38  ;;  %v4772_v5 = vmul.f32 0.35355338, %v3153_v61 }
 0x376   :  { %v4775_v6 = vmul.f32 0.35355338, %v3372_v63  ;;  %v9554_v10 = vpop.f32.mrb[33].mxu1  ;;  %v9569_v14 = vpop.f32.mrb[29].mxu0 }
 0x377   :  { %v10774_v54 = vadd.f32 %v4772_v5, %v148_v27  ;;  %v4881_v15 = vsel %vm4859_vm3, %v11427_v0, -inf  ;;  %v4890_v18 = vsel %vm4859_vm3, %v11426_v3, -inf }
 0x378   :  { %v10782_v19 = vadd.f32 %v4775_v6, %v149_v62  ;;  %v3299_v22 = vpop.f32.mrb[34].mxu1  ;;  %4882 = vmax.xlane.f32.xlu0 %v4881_v15  ;;  %4891 = vmax.xlane.f32.xlu1 %v4890_v18  ;;  %v3518_v23 = vpop.f32.mrb[30].mxu0 }
 0x379   :  { %v11425_v24 = vmax.f32 %v10774_v54, -3.4028235e+38  ;;  %v4774_v28 = vmul.f32 0.35355338, %v3299_v22  ;;  %v4777_v31 = vmul.f32 0.35355338, %v3518_v23 }
 0x37a   :  { %v11420_v32 = vmax.f32 %v10782_v19, -3.4028235e+38  ;;  %v9564_v34 = vpop.f32.mrb[35].mxu1  ;;  %v9579_v35 = vpop.f32.mrb[31].mxu0 }
 0x37b   :  { %v10786_v37 = vadd.f32 %v4774_v28, %v148_v27  ;;  %v10788_v38 = vadd.f32 %v4777_v31, %v149_v62  ;;  %v4887_v39 = vsel %vm4859_vm3, %v11425_v24, -inf }
 0x37c   :  { %v3445_v41 = vpop.f32.mrb[36].mxu1  ;;  %4888 = vmax.xlane.f32.xlu0 %v4887_v39  ;;  %v4896_v42 = vsel %vm4859_vm3, %v11420_v32, -inf  ;;  %v3664_v45 = vpop.f32.mrb[32].mxu0  ;;  %v151_v39 = vld [vmem:[#allocation7 + $0x28] sm:$0xff] }
 0x37d   :  { %v11418_v47 = vmax.f32 %v10786_v37, -3.4028235e+38  ;;  %v11416_v48 = vmax.f32 %v10788_v38, -3.4028235e+38  ;;  %v4776_v27 = vmul.f32 0.35355338, %v3445_v41  ;;  %4897 = vmax.xlane.f32.xlu1 %v4896_v42 }
 0x37e   :  { %v4779_v49 = vmul.f32 0.35355338, %v3664_v45  ;;  %v9574_v51 = vpop.f32.mrb[37].mxu1  ;;  %v9589_v52 = vpop.f32.mrb[33].mxu0 }
 0x37f   :  { %v10798_v53 = vadd.f32 %v4776_v27, %v149_v62  ;;  %v4893_v55 = vsel %vm4859_vm3, %v11418_v47, -inf  ;;  %v4902_v60 = vsel %vm4859_vm3, %v11416_v48, -inf }
 0x380   :  { %v10806_v61 = vadd.f32 %v4779_v49, %v150_v44  ;;  %v3591_v63 = vpop.f32.mrb[38].mxu1  ;;  %4894 = vmax.xlane.f32.xlu0 %v4893_v55  ;;  %v3810_v5 = vpop.f32.mrb[34].mxu0 }
 0x381   :  { %v11414_v6 = vmax.f32 %v10798_v53, -3.4028235e+38  ;;  %v4778_v10 = vmul.f32 0.35355338, %v3591_v63  ;;  %4903 = vmax.xlane.f32.xlu1 %v4902_v60  ;;  %v4781_v14 = vmul.f32 0.35355338, %v3810_v5 }
 0x382   :  { %v11412_v15 = vmax.f32 %v10806_v61, -3.4028235e+38  ;;  %v9584_v18 = vpop.f32.mrb[39].mxu1  ;;  %v9599_v22 = vpop.f32.mrb[35].mxu0 }
 0x383   :  { %v10810_v23 = vadd.f32 %v4778_v10, %v149_v62  ;;  %v10812_v28 = vadd.f32 %v4781_v14, %v150_v44  ;;  %v4899_v31 = vsel %vm4859_vm3, %v11414_v6, -inf }
 0x384   :  { %v3737_v34 = vpop.f32.mrb[40].mxu1  ;;  %4900 = vmax.xlane.f32.xlu0 %v4899_v31  ;;  %v4908_v35 = vsel %vm4859_vm3, %v11412_v15, -inf  ;;  %v3956_v41 = vpop.f32.mrb[36].mxu0 }
 0x385   :  { %v11410_v42 = vmax.f32 %v10810_v23, -3.4028235e+38  ;;  %v11409_v45 = vmax.f32 %v10812_v28, -3.4028235e+38  ;;  %v4780_v62 = vmul.f32 0.35355338, %v3737_v34  ;;  %4909 = vmax.xlane.f32.xlu1 %v4908_v35 }
 0x386   :  { %v4783_v27 = vmul.f32 0.35355338, %v3956_v41  ;;  %v9594_v49 = vpop.f32.mrb[41].mxu1  ;;  %v9609_v51 = vpop.f32.mrb[37].mxu0 }
 0x387   :  { %v10822_v52 = vadd.f32 %v4780_v62, %v150_v44  ;;  %v4905_v55 = vsel %vm4859_vm3, %v11410_v42, -inf  ;;  %v4914_v60 = vsel %vm4859_vm3, %v11409_v45, -inf }
 0x388   :  { %v10830_v63 = vadd.f32 %v4783_v27, %v151_v39  ;;  %v3883_v5 = vpop.f32.mrb[42].mxu1  ;;  %4906 = vmax.xlane.f32.xlu0 %v4905_v55  ;;  %v4102_v10 = vpop.f32.mrb[38].mxu0  ;;  %v152_v55 = vld [vmem:[#allocation7 + $0x30] sm:$0xff] }
 0x389   :  { %v11405_v14 = vmax.f32 %v10822_v52, -3.4028235e+38  ;;  %v4782_v18 = vmul.f32 0.35355338, %v3883_v5  ;;  %4915 = vmax.xlane.f32.xlu1 %v4914_v60  ;;  %v4785_v22 = vmul.f32 0.35355338, %v4102_v10 }
 0x38a   :  { %v11404_v31 = vmax.f32 %v10830_v63, -3.4028235e+38  ;;  %v9604_v34 = vpop.f32.mrb[43].mxu1  ;;  %v9619_v35 = vpop.f32.mrb[39].mxu0 }
 0x38b   :  { %v10834_v41 = vadd.f32 %v4782_v18, %v150_v44  ;;  %v10836_v62 = vadd.f32 %v4785_v22, %v151_v39  ;;  %v4911_v27 = vsel %vm4859_vm3, %v11405_v14, -inf }
 0x38c   :  { %v4029_v49 = vpop.f32.mrb[44].mxu1  ;;  %4912 = vmax.xlane.f32.xlu0 %v4911_v27  ;;  %v4920_v51 = vsel %vm4859_vm3, %v11404_v31, -inf  ;;  %v4248_v60 = vpop.f32.mrb[40].mxu0 }
 0x38d   :  { %v11406_v5 = vmax.f32 %v10834_v41, -3.4028235e+38  ;;  %v11407_v10 = vmax.f32 %v10836_v62, -3.4028235e+38  ;;  %v4784_v44 = vmul.f32 0.35355338, %v4029_v49  ;;  %4921 = vmax.xlane.f32.xlu1 %v4920_v51 }
 0x38e   :  { %v4787_v18 = vmul.f32 0.35355338, %v4248_v60  ;;  %v9614_v22 = vpop.f32.mrb[45].mxu1  ;;  %v9629_v34 = vpop.f32.mrb[41].mxu0 }
 0x38f   :  { %v10846_v35 = vadd.f32 %v4784_v44, %v151_v39  ;;  %v4917_v27 = vsel %vm4859_vm3, %v11406_v5, -inf  ;;  %v4926_v2 = vsel %vm4859_vm3, %v11407_v10, -inf }
 0x390   :  { %v10854_v31 = vadd.f32 %v4787_v18, %v152_v55  ;;  %v4175_v14 = vpop.f32.mrb[46].mxu1  ;;  %4918 = vmax.xlane.f32.xlu0 %v4917_v27 }
 0x391   :  { %v11408_v49 = vmax.f32 %v10846_v35, -3.4028235e+38  ;;  %v4786_v51 = vmul.f32 0.35355338, %v4175_v14  ;;  %4927 = vmax.xlane.f32.xlu1 %v4926_v2  ;;  %v9624_v60 = vpop.f32.mrb[47].mxu1 }
 0x392   :  { %v11411_v44 = vmax.f32 %v10854_v31, -3.4028235e+38 }
 0x393   :  { %v10858_v22 = vadd.f32 %v4786_v51, %v151_v39  ;;  %v4923_v34 = vsel %vm4859_vm3, %v11408_v49, -inf }
 0x394   :  { %v4321_v5 = vpop.f32.mrb[48].mxu1  ;;  %4924 = vmax.xlane.f32.xlu0 %v4923_v34  ;;  %v4932_v18 = vsel %vm4859_vm3, %v11411_v44, -inf }
 0x395   :  { %v11413_v27 = vmax.f32 %v10858_v22, -3.4028235e+38  ;;  %v4788_v10 = vmul.f32 0.35355338, %v4321_v5  ;;  %4933 = vmax.xlane.f32.xlu1 %v4932_v18  ;;  %v9634_v2 = vpop.f32.mrb[49].mxu1  ;;  %v153_v18 = vld [vmem:[#allocation7 + $0x38] sm:$0xff] }
 0x397   :  { %v10867_v14 = vadd.f32 %v4788_v10, %v152_v55  ;;  %v4929_v39 = vsel %vm4859_vm3, %v11413_v27, -inf }
 0x398   :  { %v4467_v51 = vpop.f32.mrb[50].mxu1  ;;  %4930 = vmax.xlane.f32.xlu0 %v4929_v39  ;;  %v4394_v60 = vpop.f32.mrb[42].mxu0 }
 0x399   :  { %v11415_v34 = vmax.f32 %v10867_v14, -3.4028235e+38  ;;  %v4790_v49 = vmul.f32 0.35355338, %v4467_v51  ;;  %v4789_v45 = vmul.f32 0.35355338, %v4394_v60 }
 0x39a   :  { %v9639_v42 = vpop.f32.mrb[43].mxu0  ;;  %v9644_v44 = vpop.f32.mrb[51].mxu1 }
 0x39b   :  { %v10873_v15 = vadd.f32 %v4790_v49, %v152_v55  ;;  %v10875_v5 = vadd.f32 %v4789_v45, %v152_v55  ;;  %v4935_v10 = vsel %vm4859_vm3, %v11415_v34, -inf }
 0x39c   :  { %4936 = vmax.xlane.f32.xlu0 %v4935_v10  ;;  %v4540_v2 = vpop.f32.mrb[44].mxu0 }
 0x39d   :  { %v11417_v39 = vmax.f32 %v10873_v15, -3.4028235e+38  ;;  %v11419_v27 = vmax.f32 %v10875_v5, -3.4028235e+38  ;;  %v4791_v6 = vmul.f32 0.35355338, %v4540_v2 }
 0x39e   :  { %v9649_v51 = vpop.f32.mrb[45].mxu0 }
 0x39f   :  { %v10882_v60 = vadd.f32 %v4791_v6, %v153_v18  ;;  %v4941_v42 = vsel %vm4859_vm3, %v11417_v39, -inf  ;;  %v4938_v45 = vsel %vm4859_vm3, %v11419_v27, -inf }
 0x3a0   :  { %v4613_v55 = vpop.f32.mrb[52].mxu1  ;;  %4942 = vmax.xlane.f32.xlu0 %v4941_v42  ;;  %4939 = vmax.xlane.f32.xlu1 %v4938_v45  ;;  %v4686_v49 = vpop.f32.mrb[46].mxu0 }
 0x3a1   :  { %v11424_v44 = vmax.f32 %v10882_v60, -3.4028235e+38  ;;  %v4792_v10 = vmul.f32 0.35355338, %v4613_v55  ;;  %v4793_v34 = vmul.f32 0.35355338, %v4686_v49 }
 0x3a2   :  { %v9654_v2 = vpop.f32.mrb[53].mxu1  ;;  %v9659_v51 = vpop.f32.mrb[47].mxu0 }
 0x3a3   :  { %v10891_v6 = vadd.f32 %v4792_v10, %v153_v18  ;;  %v10893_v48 = vadd.f32 %v4793_v34, %v153_v18  ;;  %v4944_v39 = vsel %vm4859_vm3, %v11424_v44, -inf }
 0x3a4   :  { %v4759_v47 = vpop.f32.mrb[54].mxu1  ;;  %4945 = vmax.xlane.f32.xlu1 %v4944_v39 }
 0x3a5   :  { %v11421_v42 = vmax.f32 %v10891_v6, -3.4028235e+38  ;;  %v11423_v45 = vmax.f32 %v10893_v48, -3.4028235e+38  ;;  %v4794_v27 = vmul.f32 0.35355338, %v4759_v47  ;;  %v10914_v47 = vpop.trf.xlu1 }
 0x3a6   :  { %v9664_v32 = vpop.f32.mrb[55].mxu1 }
 0x3a7   :  { %v10900_v55 = vadd.f32 %v4794_v27, %v153_v18  ;;  %v4947_v49 = vsel %vm4859_vm3, %v11421_v42, -inf  ;;  %v4950_v34 = vsel %vm4859_vm3, %v11423_v45, -inf  ;;  %v10912_v32 = vpop.trf.xlu0 }
 0x3a8   :  { %4948 = vmax.xlane.f32.xlu0 %v4947_v49  ;;  %4951 = vmax.xlane.f32.xlu1 %v4950_v34 }
 0x3a9   :  { %v11422_v39 = vmax.f32 %v10900_v55, -3.4028235e+38  ;;  %v10918_v18 = vpop.trf.xlu1 }
 0x3ab   :  { %v4953_v10 = vsel %vm4859_vm3, %v11422_v39, -inf  ;;  %v10916_v27 = vpop.trf.xlu0 }
 0x3ac   :  { %4954 = vmax.xlane.f32.xlu0 %v4953_v10 }
 0x3ad   :  { %v10922_v51 = vpop.trf.xlu1 }
 0x3af   :  { %v10920_v2 = vpop.trf.xlu0 }
 0x3b1   :  { %v10927_v34 = vpop.trf.xlu1 }
 0x3b3   :  { %v10925_v49 = vpop.trf.xlu0 }
 0x3b5   :  { %v10934_v42 = vpop.trf.xlu1 }
 0x3b6   :  { %11434 = vst [vmem:[#allocation21_spill] sm:$0xff] %v10934_v42  ;;  %v11438_v42 = vmax.f32 %v10751_v40, -3.4028235e+38 }
 0x3b7   :  { %v10932_v10 = vpop.trf.xlu0 }
 0x3b8   :  { %11433 = vst [vmem:[#allocation20_spill] sm:$0xff] %v10932_v10 }
 0x3b9   :  { %v10938_v45 = vpop.trf.xlu1 }
 0x3bb   :  { %v10936_v39 = vpop.trf.xlu0 }
 0x3bf   :  { %v10940_v44 = vpop.trf.xlu0 }
 0x3c0   :  { %11435 = vst [vmem:[#allocation22_spill] sm:$0xff] %v10940_v44  ;;  %v11437_v44 = vmax.f32 %v10736_v25, -3.4028235e+38 }
 0x3c3   :  { %v10942_v3 = vpop.trf.xlu0 }
 0x3c4   :  { %11436 = vst [vmem:[#allocation23_spill] sm:$0xff] %v10942_v3 }
 0x3d9   :  { %1306 = vxpose.xlu0.b32.start [1/2] (short) (narrow) %v10569_v13, 32  ;;  %v4874_v13 = vpop.xlane.xlu1 %4873 }
 0x3db   :  { %1274 = vxpose.xlu1.b32.start [1/2] (short) (narrow) %v10559_v9, 32  ;;  %v4960_v9 = vsub.f32 %v4831_v59, %v4874_v13 }
 0x3dd   :  { %1307 = vxpose.xlu0.b32.end [2/2] (short) (narrow) %v10564_v12, 32  ;;  %v4996_v50 = vmul.f32 1.442695, %v4960_v9 }
 0x3df   :  { %1275 = vxpose.xlu1.b32.end [2/2] (short) (narrow) %v10557_v8, 32  ;;  %9893 = vpow2.f32 %v4996_v50 }
 0x3e5   :  { %v4862_v12 = vpop.xlane.xlu0 %4861 }
 0x3e6   :  { %v4956_v8 = vsub.f32 %v4827_v4, %v4862_v12  ;;  %v11439_v4 = vmax.f32 %v10738_v26, -3.4028235e+38 }
 0x3e8   :  { %v4988_v29 = vmul.f32 1.442695, %v4956_v8  ;;  %v11444_v8 = vmax.f32 %v10774_v54, -3.4028235e+38  ;;  %v11446_v54 = vmax.f32 %v10786_v37, -3.4028235e+38 }
 0x3e9   :  { %v4865_v24 = vpop.xlane.xlu1 %4864  ;;  %v10962_v26 = vpop.eup %9893 }
 0x3ea   :  { %v4957_v30 = vsub.f32 %v4828_v11, %v4865_v24  ;;  %9895 = vpow2.f32 %v4988_v29  ;;  %v11440_v11 = vmax.f32 %v10758_v46, -3.4028235e+38  ;;  %v11442_v29 = vmax.f32 %v10765_v56, -3.4028235e+38 }
 0x3eb   :  { %v11443_v46 = vmax.f32 %v10767_v57, -3.4028235e+38  ;;  %v5064_v56 = vsel %vm4859_vm3, %v10962_v26, 0.0  ;;  %v11445_v57 = vmax.f32 %v10782_v19, -3.4028235e+38 }
 0x3ec   :  { %v4990_v3 = vmul.f32 1.442695, %v4957_v30  ;;  %v11441_v30 = vmax.f32 %v10742_v33, -3.4028235e+38 }
 0x3ee   :  { %9897 = vpow2.f32 %v4990_v3 }
 0x3f1   :  { %v4880_v0 = vpop.xlane.xlu1 %4879 }
 0x3f2   :  { %v4962_v10 = vsub.f32 %v11437_v44, %v4880_v0 }
 0x3f4   :  { %v5000_v1 = vmul.f32 1.442695, %v4962_v10 }
 0x3f5   :  { %v4868_v36 = vpop.xlane.xlu1 %4867 }
 0x3f6   :  { %v4958_v9 = vsub.f32 %v11439_v4, %v4868_v36  ;;  %9899 = vpow2.f32 %v5000_v1 }
 0x3f8   :  { %v4992_v50 = vmul.f32 1.442695, %v4958_v9 }
 0x3f9   :  { %v4886_v59 = vpop.xlane.xlu1 %4885 }
 0x3fa   :  { %v4964_v40 = vsub.f32 %v11441_v30, %v4886_v59 }
 0x3fc   :  { %v5004_v3 = vmul.f32 1.442695, %v4964_v40 }
 0x3fd   :  { %v4871_v43 = vpop.xlane.xlu0 %4870 }
 0x3fe   :  { %v4959_v58 = vsub.f32 %v11438_v42, %v4871_v43 }
 0x400   :  { %v4994_v7 = vmul.f32 1.442695, %v4959_v58  ;;  %v10968_v58 = vpop.eup %9895 }
 0x401   :  { %v4877_v13 = vpop.xlane.xlu0 %4876 }
 0x402   :  { %v4961_v24 = vsub.f32 %v11440_v11, %v4877_v13  ;;  %9901 = vpow2.f32 %v4994_v7  ;;  %v10972_v13 = vpop.eup %9897 }
 0x403   :  { %9903 = vpow2.f32 %v4992_v50  ;;  %v5052_v50 = vsel %vm4859_vm3, %v10968_v58, 0.0 }
 0x404   :  { %v4998_v43 = vmul.f32 1.442695, %v4961_v24  ;;  %v10978_v24 = vpop.eup %9899 }
 0x405   :  { %v4883_v12 = vpop.xlane.xlu0 %4882  ;;  %v4892_v25 = vpop.xlane.xlu1 %4891 }
 0x406   :  { %v4963_v0 = vsub.f32 %v11442_v29, %v4883_v12  ;;  %v4966_v42 = vsub.f32 %v11443_v46, %v4892_v25  ;;  %9905 = vpow2.f32 %v4998_v43  ;;  %v5055_v25 = vsel %vm4859_vm3, %v10972_v13, 0.0 }
 0x407   :  { %9907 = vpow2.f32 %v5004_v3  ;;  %v11447_v43 = vmax.f32 %v10788_v38, -3.4028235e+38 }
 0x408   :  { %v5002_v10 = vmul.f32 1.442695, %v4963_v0  ;;  %v5008_v4 = vmul.f32 1.442695, %v4966_v42  ;;  %v11448_v0 = vmax.f32 %v10798_v53, -3.4028235e+38 }
 0x409   :  { %v4889_v44 = vpop.xlane.xlu0 %4888  ;;  %v5070_v42 = vsel %vm4859_vm3, %v10978_v24, 0.0 }
 0x40a   :  { %v4898_v36 = vpop.xlane.xlu1 %4897  ;;  %v4965_v33 = vsub.f32 %v11444_v8, %v4889_v44  ;;  %9909 = vpow2.f32 %v5002_v10 }
 0x40b   :  { %v4968_v9 = vsub.f32 %v11445_v57, %v4898_v36  ;;  %9911 = vpow2.f32 %v5008_v4 }
 0x40c   :  { %v5006_v7 = vmul.f32 1.442695, %v4965_v33  ;;  %v10984_v30 = vpop.eup %9901  ;;  %v11449_v33 = vmax.f32 %v10806_v61, -3.4028235e+38 }
 0x40d   :  { %v4895_v59 = vpop.xlane.xlu0 %4894  ;;  %v5012_v19 = vmul.f32 1.442695, %v4968_v9  ;;  %v10990_v36 = vpop.eup %9903  ;;  %v5061_v46 = vsel %vm4859_vm3, %v10984_v30, 0.0 }
 0x40e   :  { %v4904_v1 = vpop.xlane.xlu1 %4903  ;;  %5065 = vadd.xlane.f32.xlu1 %v5064_v56  ;;  %v4967_v11 = vsub.f32 %v11446_v54, %v4895_v59  ;;  %9913 = vpow2.f32 %v5006_v7  ;;  %v11450_v56 = vmax.f32 %v10810_v23, -3.4028235e+38  ;;  %v5058_v7 = vsel %vm4859_vm3, %v10990_v36, 0.0 }
 0x40f   :  { %v4970_v37 = vsub.f32 %v11447_v43, %v4904_v1  ;;  %9915 = vpow2.f32 %v5012_v19 }
 0x410   :  { %v5010_v29 = vmul.f32 1.442695, %v4967_v11  ;;  %v10996_v10 = vpop.eup %9905 }
 0x411   :  { %v4901_v12 = vpop.xlane.xlu0 %4900  ;;  %v5016_v38 = vmul.f32 1.442695, %v4970_v37  ;;  %v11002_v4 = vpop.eup %9907  ;;  %v5067_v9 = vsel %vm4859_vm3, %v10996_v10, 0.0 }
 0x412   :  { %v4910_v40 = vpop.xlane.xlu1 %4909  ;;  %5056 = vadd.xlane.f32.xlu0 %v5055_v25  ;;  %5053 = vadd.xlane.f32.xlu1 %v5052_v50  ;;  %v4969_v44 = vsub.f32 %v11448_v0, %v4901_v12  ;;  %9917 = vpow2.f32 %v5010_v29  ;;  %v11451_v12 = vmax.f32 %v10812_v28, -3.4028235e+38  ;;  %v11452_v50 = vmax.f32 %v10822_v52, -3.4028235e+38 }
 0x413   :  { %v4972_v53 = vsub.f32 %v11449_v33, %v4910_v40  ;;  %9919 = vpow2.f32 %v5016_v38  ;;  %v5076_v29 = vsel %vm4859_vm3, %v11002_v4, 0.0 }
 0x414   :  { %v5014_v59 = vmul.f32 1.442695, %v4969_v44  ;;  %v11008_v54 = vpop.eup %9909 }
 0x415   :  { %v4907_v3 = vpop.xlane.xlu0 %4906  ;;  %v5020_v61 = vmul.f32 1.442695, %v4972_v53  ;;  %v11014_v19 = vpop.eup %9911  ;;  %v5073_v37 = vsel %vm4859_vm3, %v11008_v54, 0.0 }
 0x416   :  { %v4916_v8 = vpop.xlane.xlu1 %4915  ;;  %5062 = vadd.xlane.f32.xlu0 %v5061_v46  ;;  %5071 = vadd.xlane.f32.xlu1 %v5070_v42  ;;  %v4971_v1 = vsub.f32 %v11450_v56, %v4907_v3  ;;  %9921 = vpow2.f32 %v5014_v59  ;;  %v11453_v3 = vmax.f32 %v10830_v63, -3.4028235e+38  ;;  %v5082_v33 = vsel %vm4859_vm3, %v11014_v19, 0.0 }
 0x417   :  { %v4974_v23 = vsub.f32 %v11451_v12, %v4916_v8  ;;  %9923 = vpow2.f32 %v5020_v61  ;;  %v11454_v63 = vmax.f32 %v10834_v41, -3.4028235e+38 }
 0x418   :  { %v5018_v25 = vmul.f32 1.442695, %v4971_v1  ;;  %v11020_v0 = vpop.eup %9913 }
 0x419   :  { %v4913_v57 = vpop.xlane.xlu0 %4912  ;;  %v5024_v28 = vmul.f32 1.442695, %v4974_v23  ;;  %v11024_v42 = vpop.eup %9915  ;;  %v5079_v38 = vsel %vm4859_vm3, %v11020_v0, 0.0 }
 0x41a   :  { %v4922_v11 = vpop.xlane.xlu1 %4921  ;;  %5068 = vadd.xlane.f32.xlu0 %v5067_v9  ;;  %5059 = vadd.xlane.f32.xlu1 %v5058_v7  ;;  %v4973_v40 = vsub.f32 %v11452_v50, %v4913_v57  ;;  %9925 = vpow2.f32 %v5018_v25  ;;  %v11455_v57 = vmax.f32 %v10854_v31, -3.4028235e+38  ;;  %v11456_v7 = vmax.f32 %v10836_v62, -3.4028235e+38 }
 0x41b   :  { %v4976_v52 = vsub.f32 %v11453_v3, %v4922_v11  ;;  %9927 = vpow2.f32 %v5024_v28  ;;  %v5088_v50 = vsel %vm4859_vm3, %v11024_v42, 0.0  ;;  %v11457_v3 = vmax.f32 %v10846_v35, -3.4028235e+38 }
 0x41c   :  { %v5022_v46 = vmul.f32 1.442695, %v4973_v40  ;;  %v11030_v53 = vpop.eup %9917 }
 0x41d   :  { %v4919_v43 = vpop.xlane.xlu0 %4918  ;;  %v5028_v56 = vmul.f32 1.442695, %v4976_v52  ;;  %v11038_v61 = vpop.eup %9919  ;;  %v5085_v25 = vsel %vm4859_vm3, %v11030_v53, 0.0 }
 0x41e   :  { %v4928_v44 = vpop.xlane.xlu1 %4927  ;;  %5074 = vadd.xlane.f32.xlu0 %v5073_v37  ;;  %5077 = vadd.xlane.f32.xlu1 %v5076_v29  ;;  %v4975_v1 = vsub.f32 %v11454_v63, %v4919_v43  ;;  %9929 = vpow2.f32 %v5022_v46  ;;  %v5094_v37 = vsel %vm4859_vm3, %v11038_v61, 0.0 }
 0x41f   :  { %v4978_v11 = vsub.f32 %v11456_v7, %v4928_v44  ;;  %9931 = vpow2.f32 %v5028_v56  ;;  %v11458_v56 = vmax.f32 %v10875_v5, -3.4028235e+38  ;;  %v11460_v5 = vmax.f32 %v10882_v60, -3.4028235e+38 }
 0x420   :  { %v11044_v40 = vpop.eup %9921  ;;  %v5026_v31 = vmul.f32 1.442695, %v4975_v1  ;;  %v11459_v1 = vmax.f32 %v10858_v22, -3.4028235e+38 }
 0x421   :  { %v4925_v8 = vpop.xlane.xlu0 %4924  ;;  %v5032_v41 = vmul.f32 1.442695, %v4978_v11  ;;  %v11046_v62 = vpop.eup %9923  ;;  %v5091_v43 = vsel %vm4859_vm3, %v11044_v40, 0.0 }
 0x422   :  { %v4934_v59 = vpop.xlane.xlu1 %4933  ;;  %5080 = vadd.xlane.f32.xlu0 %v5079_v38  ;;  %5083 = vadd.xlane.f32.xlu1 %v5082_v33  ;;  %v4977_v52 = vsub.f32 %v11457_v3, %v4925_v8  ;;  %v5100_v33 = vsel %vm4859_vm3, %v11046_v62, 0.0 }
 0x423   :  { %v4980_v9 = vsub.f32 %v11455_v57, %v4934_v59 }
 0x424   :  { %v11052_v29 = vpop.eup %9925  ;;  %v5030_v8 = vmul.f32 1.442695, %v4977_v52 }
 0x425   :  { %v5036_v12 = vmul.f32 1.442695, %v4980_v9  ;;  %v4931_v23 = vpop.xlane.xlu0 %4930  ;;  %v11054_v28 = vpop.eup %9927  ;;  %v5097_v38 = vsel %vm4859_vm3, %v11052_v29, 0.0 }
 0x426   :  { %5086 = vadd.xlane.f32.xlu0 %v5085_v25  ;;  %5089 = vadd.xlane.f32.xlu1 %v5088_v50  ;;  %v4979_v57 = vsub.f32 %v11459_v1, %v4931_v23  ;;  %v5106_v25 = vsel %vm4859_vm3, %v11054_v28, 0.0 }
 0x427   :  { %9933 = vpow2.f32 %v5036_v12 }
 0x428   :  { %9935 = vpow2.f32 %v5026_v31  ;;  %v11062_v59 = vpop.eup %9929  ;;  %v5034_v22 = vmul.f32 1.442695, %v4979_v57 }
 0x429   :  { %v4937_v44 = vpop.xlane.xlu0 %4936  ;;  %9937 = vpow2.f32 %v5032_v41  ;;  %v11068_v35 = vpop.eup %9931  ;;  %v5103_v12 = vsel %vm4859_vm3, %v11062_v59, 0.0 }
 0x42a   :  { %5092 = vadd.xlane.f32.xlu0 %v5091_v43  ;;  %5095 = vadd.xlane.f32.xlu1 %v5094_v37  ;;  %v11461_v43 = vmax.f32 %v10867_v14, -3.4028235e+38  ;;  %v5112_v60 = vsel %vm4859_vm3, %v11068_v35, 0.0 }
 0x42c   :  { %v4981_v37 = vsub.f32 %v11461_v43, %v4937_v44  ;;  %v11463_v44 = vmax.f32 %v10873_v15, -3.4028235e+38  ;;  %v11465_v15 = vmax.f32 %v10891_v6, -3.4028235e+38 }
 0x42d   :  { %v4940_v46 = vpop.xlane.xlu1 %4939  ;;  %v4943_v7 = vpop.xlane.xlu0 %4942 }
 0x42e   :  { %v4982_v63 = vsub.f32 %v11458_v56, %v4940_v46  ;;  %5098 = vadd.xlane.f32.xlu0 %v5097_v38  ;;  %5101 = vadd.xlane.f32.xlu1 %v5100_v33  ;;  %v11462_v33 = vmax.f32 %v10893_v48, -3.4028235e+38  ;;  %v5038_v14 = vmul.f32 1.442695, %v4981_v37  ;;  %v4983_v1 = vsub.f32 %v11463_v44, %v4943_v7 }
 0x430   :  { %v5040_v9 = vmul.f32 1.442695, %v4982_v63 }
 0x431   :  { %v4946_v11 = vpop.xlane.xlu1 %4945  ;;  %v11074_v50 = vpop.eup %9933 }
 0x432   :  { %v4984_v31 = vsub.f32 %v11460_v5, %v4946_v11  ;;  %5104 = vadd.xlane.f32.xlu0 %v5103_v12  ;;  %5107 = vadd.xlane.f32.xlu1 %v5106_v25  ;;  %9939 = vpow2.f32 %v5040_v9  ;;  %v11078_v41 = vpop.eup %9935  ;;  %v5124_v46 = vsel %vm4859_vm3, %v11074_v50, 0.0  ;;  %v11464_v11 = vmax.f32 %v10900_v55, -3.4028235e+38 }
 0x433   :  { %9941 = vpow2.f32 %v5030_v8  ;;  %v11086_v38 = vpop.eup %9937  ;;  %v5109_v9 = vsel %vm4859_vm3, %v11078_v41, 0.0  ;;  %v5042_v5 = vmul.f32 1.442695, %v4983_v1 }
 0x434   :  { %v5044_v23 = vmul.f32 1.442695, %v4984_v31  ;;  %v5118_v8 = vsel %vm4859_vm3, %v11086_v38, 0.0 }
 0x435   :  { %v4949_v3 = vpop.xlane.xlu0 %4948  ;;  %v4952_v52 = vpop.xlane.xlu1 %4951 }
 0x436   :  { %9943 = vpow2.f32 %v5044_v23  ;;  %v4986_v56 = vsub.f32 %v11462_v33, %v4952_v52  ;;  %5125 = vadd.xlane.f32.xlu0 %v5124_v46  ;;  %5113 = vadd.xlane.f32.xlu1 %v5112_v60  ;;  %v4985_v7 = vsub.f32 %v11465_v15, %v4949_v3 }
 0x437   :  { %9945 = vpow2.f32 %v5034_v22 }
 0x438   :  { %v5048_v63 = vmul.f32 1.442695, %v4986_v56  ;;  %v5046_v23 = vmul.f32 1.442695, %v4985_v7 }
 0x439   :  { %v4955_v57 = vpop.xlane.xlu0 %4954 }
 0x43a   :  { %v4987_v12 = vsub.f32 %v11464_v11, %v4955_v57  ;;  %5110 = vadd.xlane.f32.xlu0 %v5109_v9  ;;  %5119 = vadd.xlane.f32.xlu1 %v5118_v8  ;;  %9947 = vpow2.f32 %v5048_v63 }
 0x43b   :  { %9949 = vpow2.f32 %v5038_v14 }
 0x43c   :  { %v5050_v48 = vmul.f32 1.442695, %v4987_v12  ;;  %v11098_v25 = vpop.eup %9939 }
 0x43d   :  { %v5130_v31 = vsel %vm4859_vm3, %v11098_v25, 0.0  ;;  %v11104_v22 = vpop.eup %9941 }
 0x43e   :  { %9951 = vpow2.f32 %v5050_v48  ;;  %5131 = vadd.xlane.f32.xlu0 %v5130_v31  ;;  %v5115_v6 = vsel %vm4859_vm3, %v11104_v22, 0.0 }
 0x43f   :  { %9953 = vpow2.f32 %v5042_v5 }
 0x440   :  { %v11106_v55 = vpop.eup %9943  ;;  %9955 = vpow2.f32 %v5046_v23 }
 0x441   :  { %v5136_v43 = vsel %vm4859_vm3, %v11106_v55, 0.0  ;;  %v11110_v37 = vpop.eup %9945 }
 0x442   :  { %5137 = vadd.xlane.f32.xlu1 %v5136_v43  ;;  %5116 = vadd.xlane.f32.xlu0 %v5115_v6  ;;  %v5121_v52 = vsel %vm4859_vm3, %v11110_v37, 0.0 }
 0x444   :  { %v11114_v3 = vpop.eup %9947 }
 0x445   :  { %v5142_v46 = vsel %vm4859_vm3, %v11114_v3, 0.0  ;;  %v11120_v60 = vpop.eup %9949 }
 0x446   :  { %5122 = vadd.xlane.f32.xlu0 %v5121_v52  ;;  %5143 = vadd.xlane.f32.xlu1 %v5142_v46  ;;  %v5127_v63 = vsel %vm4859_vm3, %v11120_v60, 0.0 }
 0x448   :  { %v11122_v33 = vpop.eup %9951 }
 0x449   :  { %v5145_v56 = vsel %vm4859_vm3, %v11122_v33, 0.0  ;;  %v11128_v14 = vpop.eup %9953 }
 0x44a   :  { %5128 = vadd.xlane.f32.xlu0 %v5127_v63  ;;  %5146 = vadd.xlane.f32.xlu1 %v5145_v56  ;;  %v5133_v44 = vsel %vm4859_vm3, %v11128_v14, 0.0  ;;  %v11132_v1 = vpop.eup %9955 }
 0x44b   :  { %v5139_v57 = vsel %vm4859_vm3, %v11132_v1, 0.0 }
 0x44e   :  { %5134 = vadd.xlane.f32.xlu0 %v5133_v44 }
 0x452   :  { %5140 = vadd.xlane.f32.xlu0 %v5139_v57 }
 0x459   :  { %v11142_v8 = vpop.trf.xlu0 }
 0x45b   :  { %v11139_v9 = vpop.trf.xlu1 }
 0x45d   :  { %v11146_v12 = vpop.trf.xlu0 }
 0x45f   :  { %v11144_v11 = vpop.trf.xlu1 }
 0x461   :  { %v11150_v5 = vpop.trf.xlu0 }
 0x463   :  { %v11148_v48 = vpop.trf.xlu1 }
 0x467   :  { %v11152_v15 = vpop.trf.xlu1 }
 0x47d   :  { %1338 = vxpose.xlu1.b32.start [1/2] (short) (narrow) %v10583_v17, 32  ;;  %v11154_v17 = vpop.trf.xlu0 }
 0x47f   :  { %1370 = vxpose.xlu0.b32.start [1/2] (short) (narrow) %v10587_v21, 32 }
 0x481   :  { %1339 = vxpose.xlu1.b32.end [2/2] (short) (narrow) %v10580_v16, 32 }
 0x483   :  { %1371 = vxpose.xlu0.b32.end [2/2] (short) (narrow) %v10585_v20, 32 }
 0x49b   :  { %v5066_v21 = vpop.xlane.xlu1 %5065 }
 0x49f   :  { %v5057_v16 = vpop.xlane.xlu0 %5056  ;;  %v5054_v7 = vpop.xlane.xlu1 %5053 }
 0x4a0   :  { %9957 = vrcp.f32 %v5057_v16 }
 0x4a1   :  { %9959 = vrcp.f32 %v5054_v7  ;;  %v11466_v7 = vmov 0.0  }
 0x4a3   :  { %v5063_v20 = vpop.xlane.xlu0 %5062  ;;  %v5072_v31 = vpop.xlane.xlu1 %5071 }
 0x4a4   :  { %9961 = vrcp.f32 %v5063_v20 }
 0x4a7   :  { %v5069_v23 = vpop.xlane.xlu0 %5068  ;;  %v5060_v43 = vpop.xlane.xlu1 %5059 }
 0x4a8   :  { %9963 = vrcp.f32 %v5069_v23 }
 0x4a9   :  { %9965 = vrcp.f32 %v5060_v43 }
 0x4aa   :  { %v9958_v6 = vpop.eup %9957  ;;  %9967 = vrcp.f32 %v5066_v21 }
 0x4ab   :  { %v9960_v52 = vpop.eup %9959  ;;  %v5181_v46 = vmul.f32 %v9958_v6, %v10972_v13  ;;  %v5075_v56 = vpop.xlane.xlu0 %5074 }
 0x4ac   :  { %v5078_v63 = vpop.xlane.xlu1 %5077  ;;  %v5180_v44 = vmul.f32 %v9960_v52, %v10968_v58  ;;  %9969 = vrcp.f32 %v5075_v56 }
 0x4ad   :  { %9673 = vmatmul.mubr.msk.f32.vlgmr.msra.gmra.mrb[56].mxu1 %vm4859_vm3, %v5181_v46  ;;  %9971 = vrcp.f32 %v5072_v31 }
 0x4ae   :  { %v9962_v57 = vpop.eup %9961  ;;  %9668 = vmatmul.mubr.msk.f32.vlgmr.msra.gmra.mrb[48].mxu0 %vm4859_vm3, %v5180_v44  ;;  %9681 = vmatpush3.xpose.msk.msra.mxu1 %vm4859_vm3, %v10918_v18 }
 0x4af   :  { %v5183_v16 = vmul.f32 %v9962_v57, %v10984_v30  ;;  %9676 = vmatpush3.xpose.msk.msra.mxu0 %vm4859_vm3, %v10914_v47  ;;  %v5081_v13 = vpop.xlane.xlu0 %5080  ;;  %9682 = vmatprep.mubr.msk.f32.mxu1 %vm10217_vm1, %v11466_v7 }
 0x4b0   :  { %v5084_v21 = vpop.xlane.xlu1 %5083  ;;  %9973 = vrcp.f32 %v5081_v13  ;;  %9690 = vmatprep.subr.mxu1 %v11466_v7  ;;  %9677 = vmatprep.mubr.msk.f32.mxu0 %vm10217_vm1, %v11466_v7  ;;  %v11468_v13 = vld [vmem:[#allocation23_spill] sm:$0xff] }
 0x4b1   :  { %9683 = vmatmul.mubr.msk.f32.vlgmr.msra.gmra.mrb[58].mxu1 %vm4859_vm3, %v5183_v16  ;;  %9685 = vmatprep.subr.mxu0 %v11466_v7  ;;  %9975 = vrcp.f32 %v5078_v63 }
 0x4b2   :  { %v9964_v18 = vpop.eup %9963  ;;  %9691 = vmatpush3.xpose.msk.msra.mxu1 %vm4859_vm3, %v10916_v27  ;;  %9692 = vmatprep.mubr.msk.f32.mxu1 %vm10217_vm1, %v11466_v7 }
 0x4b3   :  { %v9966_v47 = vpop.eup %9965  ;;  %v5185_v58 = vmul.f32 %v9964_v18, %v10996_v10  ;;  %v5087_v30 = vpop.xlane.xlu0 %5086  ;;  %9700 = vmatprep.subr.mxu1 %v11466_v7 }
 0x4b4   :  { %v5090_v20 = vpop.xlane.xlu1 %5089  ;;  %v5182_v31 = vmul.f32 %v9966_v47, %v10990_v36  ;;  %9977 = vrcp.f32 %v5087_v30  ;;  %v9968_v23 = vpop.eup %9967 }
 0x4b5   :  { %9693 = vmatmul.mubr.msk.f32.vlgmr.msra.gmra.mrb[60].mxu1 %vm4859_vm3, %v5185_v58  ;;  %9979 = vrcp.f32 %v5084_v21  ;;  %v5184_v36 = vmul.f32 %v9968_v23, %v10962_v26 }
 0x4b6   :  { %v9970_v43 = vpop.eup %9969  ;;  %9678 = vmatmul.mubr.msk.f32.vlgmr.msra.gmra.mrb[50].mxu0 %vm4859_vm3, %v5182_v31  ;;  %9701 = vmatpush3.xpose.msk.msra.mxu1 %vm4859_vm3, %v10925_v49 }
 0x4b7   :  { %v5187_v27 = vmul.f32 %v9970_v43, %v11008_v54  ;;  %9686 = vmatpush3.xpose.msk.msra.mxu0 %vm4859_vm3, %v10912_v32  ;;  %v5093_v10 = vpop.xlane.xlu0 %5092  ;;  %9687 = vmatprep.mubr.msk.f32.mxu0 %vm10217_vm1, %v11466_v7  ;;  %v9972_v49 = vpop.eup %9971 }
 0x4b8   :  { %v5096_v6 = vpop.xlane.xlu1 %5095  ;;  %9981 = vrcp.f32 %v5093_v10  ;;  %9695 = vmatprep.subr.mxu0 %v11466_v7  ;;  %9702 = vmatprep.mubr.msk.f32.mxu1 %vm10217_vm1, %v11466_v7  ;;  %v5186_v46 = vmul.f32 %v9972_v49, %v10978_v24 }
 0x4b9   :  { %9710 = vmatprep.subr.mxu1 %v11466_v7  ;;  %9703 = vmatmul.mubr.msk.f32.vlgmr.msra.gmra.mrb[62].mxu1 %vm4859_vm3, %v5187_v27  ;;  %9983 = vrcp.f32 %v5090_v20 }
 0x4ba   :  { %v9974_v54 = vpop.eup %9973  ;;  %9688 = vmatmul.mubr.msk.f32.vlgmr.msra.gmra.mrb[52].mxu0 %vm4859_vm3, %v5184_v36  ;;  %9711 = vmatpush3.xpose.msk.msra.mxu1 %vm4859_vm3, %v10927_v34 }
 0x4bb   :  { %v5189_v32 = vmul.f32 %v9974_v54, %v11020_v0  ;;  %9696 = vmatpush3.xpose.msk.msra.mxu0 %vm4859_vm3, %v10920_v2  ;;  %v5099_v26 = vpop.xlane.xlu0 %5098  ;;  %9697 = vmatprep.mubr.msk.f32.mxu0 %vm10217_vm1, %v11466_v7  ;;  %v9976_v34 = vpop.eup %9975 }
 0x4bc   :  { %v5102_v52 = vpop.xlane.xlu1 %5101  ;;  %9985 = vrcp.f32 %v5099_v26  ;;  %9705 = vmatprep.subr.mxu0 %v11466_v7  ;;  %9712 = vmatprep.mubr.msk.f32.mxu1 %vm10217_vm1, %v11466_v7  ;;  %v5188_v56 = vmul.f32 %v9976_v34, %v11002_v4  ;;  %v11467_v4 = vld [vmem:[#allocation21_spill] sm:$0xff] }
 0x4bd   :  { %9720 = vmatprep.subr.mxu1 %v11466_v7  ;;  %9713 = vmatmul.mubr.msk.f32.vlgmr.msra.gmra.mrb[64].mxu1 %vm4859_vm3, %v5189_v32  ;;  %9987 = vrcp.f32 %v5096_v6 }
 0x4be   :  { %v9978_v0 = vpop.eup %9977  ;;  %9698 = vmatmul.mubr.msk.f32.vlgmr.msra.gmra.mrb[54].mxu0 %vm4859_vm3, %v5186_v46  ;;  %9721 = vmatpush3.xpose.msk.msra.mxu1 %vm4859_vm3, %v10938_v45 }
 0x4bf   :  { %v5191_v2 = vmul.f32 %v9978_v0, %v11030_v53  ;;  %9706 = vmatpush3.xpose.msk.msra.mxu0 %vm4859_vm3, %v10922_v51  ;;  %v5105_v24 = vpop.xlane.xlu0 %5104  ;;  %9707 = vmatprep.mubr.msk.f32.mxu0 %vm10217_vm1, %v11466_v7  ;;  %v9980_v45 = vpop.eup %9979 }
 0x4c0   :  { %9989 = vrcp.f32 %v5105_v24  ;;  %v5108_v63 = vpop.xlane.xlu1 %5107  ;;  %9715 = vmatprep.subr.mxu0 %v11466_v7  ;;  %9722 = vmatprep.mubr.msk.f32.mxu1 %vm10217_vm1, %v11466_v7  ;;  %v5190_v57 = vmul.f32 %v9980_v45, %v11014_v19  ;;  %v11469_v19 = vld [vmem:[#allocation20_spill] sm:$0xff] }
 0x4c1   :  { %9730 = vmatprep.subr.mxu1 %v11466_v7  ;;  %9723 = vmatmul.mubr.msk.f32.vlgmr.msra.gmra.mrb[66].mxu1 %vm4859_vm3, %v5191_v2  ;;  %9991 = vrcp.f32 %v5102_v52 }
 0x4c2   :  { %v9982_v53 = vpop.eup %9981  ;;  %9708 = vmatmul.mubr.msk.f32.vlgmr.msra.gmra.mrb[56].mxu0 %vm4859_vm3, %v5188_v56  ;;  %9731 = vmatpush3.xpose.msk.msra.mxu1 %vm4859_vm3, %v10936_v39  ;;  %9993 = vrcp.f32 %v5108_v63 }
 0x4c3   :  { %v5193_v51 = vmul.f32 %v9982_v53, %v11044_v40  ;;  %9716 = vmatpush3.xpose.msk.msra.mxu0 %vm4859_vm3, %v11467_v4  ;;  %v11228_v44 = vpop.xlane.xlu0 %5125  ;;  %9717 = vmatprep.mubr.msk.f32.mxu0 %vm10217_vm1, %v11466_v7  ;;  %v9984_v16 = vpop.eup %9983 }
 0x4c4   :  { %9725 = vmatprep.subr.mxu0 %v11466_v7  ;;  %9732 = vmatprep.mubr.msk.f32.mxu1 %vm10217_vm1, %v11466_v7  ;;  %v5114_v40 = vpop.xlane.xlu1 %5113  ;;  %v5192_v47 = vmul.f32 %v9984_v16, %v11024_v42  ;;  %v11470_v42 = vld [vmem:[#allocation22_spill] sm:$0xff] }
 0x4c5   :  { %9740 = vmatprep.subr.mxu1 %v11466_v7  ;;  %9733 = vmatmul.mubr.msk.f32.vlgmr.msra.gmra.mrb[68].mxu1 %vm4859_vm3, %v5193_v51 }
 0x4c6   :  { %v9986_v39 = vpop.eup %9985  ;;  %9718 = vmatmul.mubr.msk.f32.vlgmr.msra.gmra.mrb[58].mxu0 %vm4859_vm3, %v5190_v57  ;;  %9741 = vmatpush3.xpose.msk.msra.mxu1 %vm4859_vm3, %v11468_v13 }
 0x4c7   :  { %v5195_v21 = vmul.f32 %v9986_v39, %v11052_v29  ;;  %9726 = vmatpush3.xpose.msk.msra.mxu0 %vm4859_vm3, %v11469_v19  ;;  %v5111_v18 = vpop.xlane.xlu0 %5110  ;;  %9727 = vmatprep.mubr.msk.f32.mxu0 %vm10217_vm1, %v11466_v7  ;;  %v9988_v58 = vpop.eup %9987 }
 0x4c8   :  { %9995 = vrcp.f32 %v5111_v18  ;;  %9735 = vmatprep.subr.mxu0 %v11466_v7  ;;  %9742 = vmatprep.mubr.msk.f32.mxu1 %vm10217_vm1, %v11466_v7  ;;  %v5194_v20 = vmul.f32 %v9988_v58, %v11038_v61  ;;  %v5120_v31 = vpop.xlane.xlu1 %5119 }
 0x4c9   :  { %9750 = vmatprep.subr.mxu1 %v11466_v7  ;;  %9743 = vmatmul.mubr.msk.f32.vlgmr.msra.gmra.mrb[70].mxu1 %vm4859_vm3, %v5195_v21  ;;  %9997 = vrcp.f32 %v5114_v40 }
 0x4ca   :  { %v9990_v29 = vpop.eup %9989  ;;  %9728 = vmatmul.mubr.msk.f32.vlgmr.msra.gmra.mrb[60].mxu0 %vm4859_vm3, %v5192_v47  ;;  %9751 = vmatpush3.xpose.msk.msra.mxu1 %vm4859_vm3, %v11144_v11  ;;  %9999 = vrcp.f32 %v5120_v31 }
 0x4cb   :  { %v5197_v30 = vmul.f32 %v9990_v29, %v11062_v59  ;;  %9736 = vmatpush3.xpose.msk.msra.mxu0 %vm4859_vm3, %v11470_v42  ;;  %9737 = vmatprep.mubr.msk.f32.mxu0 %vm10217_vm1, %v11466_v7  ;;  %v5132_v23 = vpop.xlane.xlu0 %5131  ;;  %v9992_v43 = vpop.eup %9991 }
 0x4cc   :  { %9745 = vmatprep.subr.mxu0 %v11466_v7  ;;  %9752 = vmatprep.mubr.msk.f32.mxu1 %vm10217_vm1, %v11466_v7  ;;  %v5196_v61 = vmul.f32 %v9992_v43, %v11046_v62  ;;  %v9994_v11 = vpop.eup %9993 }
 0x4cd   :  { %9760 = vmatprep.subr.mxu1 %v11466_v7  ;;  %9753 = vmatmul.mubr.msk.f32.vlgmr.msra.gmra.mrb[72].mxu1 %vm4859_vm3, %v5197_v30  ;;  %v5198_v62 = vmul.f32 %v9994_v11, %v11054_v28 }
 0x4ce   :  { %9738 = vmatmul.mubr.msk.f32.vlgmr.msra.gmra.mrb[62].mxu0 %vm4859_vm3, %v5194_v20  ;;  %9761 = vmatpush3.xpose.msk.msra.mxu1 %vm4859_vm3, %v11152_v15 }
 0x4cf   :  { %9746 = vmatpush3.xpose.msk.msra.mxu0 %vm4859_vm3, %v11139_v9  ;;  %9747 = vmatprep.mubr.msk.f32.mxu0 %vm10217_vm1, %v11466_v7  ;;  %v5117_v59 = vpop.xlane.xlu0 %5116 }
 0x4d0   :  { %9755 = vmatprep.subr.mxu0 %v11466_v7  ;;  %9762 = vmatprep.mubr.msk.f32.mxu1 %vm10217_vm1, %v11466_v7  ;;  %10001 = vrcp.f32 %v5117_v59 }
 0x4d1   :  { %9770 = vmatprep.subr.mxu1 %v11466_v7 }
 0x4d2   :  { %v9996_v15 = vpop.eup %9995  ;;  %9748 = vmatmul.mubr.msk.f32.vlgmr.msra.gmra.mrb[64].mxu0 %vm4859_vm3, %v5196_v61 }
 0x4d3   :  { %v5199_v9 = vmul.f32 %v9996_v15, %v11078_v41  ;;  %9756 = vmatpush3.xpose.msk.msra.mxu0 %vm4859_vm3, %v11148_v48  ;;  %9757 = vmatprep.mubr.msk.f32.mxu0 %vm10217_vm1, %v11466_v7  ;;  %v5123_v27 = vpop.xlane.xlu0 %5122  ;;  %v9998_v10 = vpop.eup %9997 }
 0x4d4   :  { %9765 = vmatprep.subr.mxu0 %v11466_v7  ;;  %10003 = vrcp.f32 %v5123_v27  ;;  %v5200_v28 = vmul.f32 %v9998_v10, %v11068_v35  ;;  %v10000_v41 = vpop.eup %9999 }
 0x4d5   :  { %9763 = vmatmul.mubr.msk.f32.vlgmr.msra.gmra.mrb[74].mxu1 %vm4859_vm3, %v5199_v9  ;;  %10005 = vrcp.f32 %v11228_v44 }
 0x4d6   :  { %9758 = vmatmul.mubr.msk.f32.vlgmr.msra.gmra.mrb[66].mxu0 %vm4859_vm3, %v5198_v62  ;;  %9771 = vmatpush3.xpose.msk.msra.mxu1 %vm4859_vm3, %v11146_v12 }
 0x4d7   :  { %9766 = vmatpush3.xpose.msk.msra.mxu0 %vm4859_vm3, %v11142_v8  ;;  %9767 = vmatprep.mubr.msk.f32.mxu0 %vm10217_vm1, %v11466_v7  ;;  %v5202_v8 = vmul.f32 %v10000_v41, %v11086_v38  ;;  %v5138_v38 = vpop.xlane.xlu1 %5137 }
 0x4d8   :  { %9775 = vmatprep.subr.mxu0 %v11466_v7  ;;  %9772 = vmatprep.mubr.msk.f32.mxu1 %vm10217_vm1, %v11466_v7 }
 0x4d9   :  { %9780 = vmatprep.subr.mxu1 %v11466_v7 }
 0x4da   :  { %9768 = vmatmul.mubr.msk.f32.vlgmr.msra.gmra.mrb[68].mxu0 %vm4859_vm3, %v5200_v28  ;;  %v10002_v48 = vpop.eup %10001 }
 0x4db   :  { %9776 = vmatpush3.xpose.msk.msra.mxu0 %vm4859_vm3, %v11150_v5  ;;  %9777 = vmatprep.mubr.msk.f32.mxu0 %vm10217_vm1, %v11466_v7  ;;  %v5201_v35 = vmul.f32 %v10002_v48, %v11104_v22  ;;  %v5129_v22 = vpop.xlane.xlu0 %5128 }
 0x4dc   :  { %9785 = vmatprep.subr.mxu0 %v11466_v7  ;;  %10007 = vrcp.f32 %v5129_v22 }
 0x4dd   :  { %9773 = vmatmul.mubr.msk.f32.vlgmr.msra.gmra.mrb[76].mxu1 %vm4859_vm3, %v5201_v35  ;;  %10009 = vrcp.f32 %v5132_v23 }
 0x4de   :  { %9778 = vmatmul.mubr.msk.f32.vlgmr.msra.gmra.mrb[70].mxu0 %vm4859_vm3, %v5202_v8  ;;  %v10004_v12 = vpop.eup %10003  ;;  %9781 = vmatpush3.xpose.msk.msra.mxu1 %vm4859_vm3, %v11154_v17  ;;  %v5144_v17 = vpop.xlane.xlu1 %5143  ;;  %10011 = vrcp.f32 %v5138_v38 }
 0x4df   :  { %9782 = vmatprep.mubr.msk.f32.mxu1 %vm10217_vm1, %v11466_v7  ;;  %v5203_v5 = vmul.f32 %v10004_v12, %v11110_v37  ;;  %9787 = vmatprep.mubr.msk.f32.mxu0 %vm10217_vm1, %v11466_v7  ;;  %v5135_v6 = vpop.xlane.xlu0 %5134  ;;  %v10006_v49 = vpop.eup %10005 }
 0x4e0   :  { %9790 = vmatprep.subr.mxu1 %v11466_v7  ;;  %10013 = vrcp.f32 %v5135_v6  ;;  %v5204_v32 = vmul.f32 %v10006_v49, %v11074_v50 }
 0x4e1   :  { %9783 = vmatmul.mubr.msk.f32.vlgmr.msra.gmra.mrb[78].mxu1 %vm4859_vm3, %v5203_v5  ;;  %10015 = vrcp.f32 %v5144_v17 }
 0x4e2   :  { %9792 = vmatprep.mubr.msk.f32.mxu1 %vm10217_vm1, %v11466_v7  ;;  %v5147_v36 = vpop.xlane.xlu1 %5146 }
 0x4e3   :  { %v5141_v37 = vpop.xlane.xlu0 %5140 }
 0x4e4   :  { %10017 = vrcp.f32 %v5141_v37 }
 0x4e5   :  { %10019 = vrcp.f32 %v5147_v36 }
 0x4e6   :  { %v10008_v52 = vpop.eup %10007 }
 0x4e7   :  { %v5205_v34 = vmul.f32 %v10008_v52, %v11120_v60  ;;  %v10010_v50 = vpop.eup %10009 }
 0x4e8   :  { %v10012_v24 = vpop.eup %10011  ;;  %v5206_v56 = vmul.f32 %v10010_v50, %v11098_v25 }
 0x4e9   :  { %v5208_v51 = vmul.f32 %v10012_v24, %v11106_v55 }
 0x4ea   :  { %v10014_v63 = vpop.eup %10013 }
 0x4eb   :  { %v10016_v53 = vpop.eup %10015  ;;  %v5207_v4 = vmul.f32 %v10014_v63, %v11128_v14 }
 0x4ec   :  { %v5210_v55 = vmul.f32 %v10016_v53, %v11114_v3 }
 0x4ee   :  { %v10018_v25 = vpop.eup %10017 }
 0x4ef   :  { %v5209_v14 = vmul.f32 %v10018_v25, %v11132_v1  ;;  %v10020_v57 = vpop.eup %10019 }
 0x4f0   :  { %v5211_v3 = vmul.f32 %v10020_v57, %v11122_v33 }
 0x4fd   :  { %v1354_v54 = vpop.trf.xlu1 }
 0x4fe   :  { %9786 = vmatpush3.xpose.msk.msra.mxu0 %vm4859_vm3, %v1354_v54 }
 0x4ff   :  { %v1386_v26 = vpop.trf.xlu0  ;;  %9795 = vmatprep.subr.mxu0 %v11466_v7 }
 0x501   :  { %9788 = vmatmul.mubr.msk.f32.vlgmr.msra.gmra.mrb[72].mxu0 %vm4859_vm3, %v5204_v32  ;;  %v1355_v46 = vpop.trf.xlu1 }
 0x502   :  { %9791 = vmatpush3.xpose.msk.msra.mxu1 %vm4859_vm3, %v1355_v46  ;;  %9797 = vmatprep.mubr.msk.f32.mxu0 %vm10217_vm1, %v11466_v7 }
 0x503   :  { %v1387_v0 = vpop.trf.xlu0  ;;  %9800 = vmatprep.subr.mxu1 %v11466_v7 }
 0x505   :  { %9793 = vmatmul.mubr.msk.f32.vlgmr.msra.gmra.mrb[80].mxu1 %vm4859_vm3, %v5205_v34  ;;  %v1356_v2 = vpop.trf.xlu1 }
 0x506   :  { %9796 = vmatpush3.xpose.msk.msra.mxu0 %vm4859_vm3, %v1356_v2  ;;  %9802 = vmatprep.mubr.msk.f32.mxu1 %vm10217_vm1, %v11466_v7 }
 0x507   :  { %9805 = vmatprep.subr.mxu0 %v11466_v7  ;;  %v1388_v45 = vpop.trf.xlu0 }
 0x509   :  { %9798 = vmatmul.mubr.msk.f32.vlgmr.msra.gmra.mrb[74].mxu0 %vm4859_vm3, %v5206_v56  ;;  %v1357_v60 = vpop.trf.xlu1 }
 0x50a   :  { %9801 = vmatpush3.xpose.msk.msra.mxu1 %vm4859_vm3, %v1357_v60  ;;  %9806 = vmatpush3.xpose.msk.msra.mxu0 %vm4859_vm3, %v1386_v26 }
 0x50b   :  { %9807 = vmatprep.mubr.msk.f32.mxu0 %vm10217_vm1, %v11466_v7  ;;  %9810 = vmatprep.subr.mxu1 %v11466_v7  ;;  %v1389_v44 = vpop.trf.xlu0 }
 0x50c   :  { %9815 = vmatprep.subr.mxu0 %v11466_v7 }
 0x50d   :  { %9803 = vmatmul.mubr.msk.f32.vlgmr.msra.gmra.mrb[82].mxu1 %vm4859_vm3, %v5207_v4  ;;  %9808 = vmatmul.mubr.msk.f32.vlgmr.msra.gmra.mrb[76].mxu0 %vm4859_vm3, %v5208_v51 }
 0x50e   :  { %9811 = vmatpush3.xpose.msk.msra.mxu1 %vm4859_vm3, %v1387_v0  ;;  %9816 = vmatpush3.xpose.msk.msra.mxu0 %vm4859_vm3, %v1388_v45 }
 0x50f   :  { %9812 = vmatprep.mubr.msk.f32.mxu1 %vm10217_vm1, %v11466_v7  ;;  %9817 = vmatprep.mubr.msk.f32.mxu0 %vm10217_vm1, %v11466_v7 }
 0x510   :  { %9820 = vmatprep.subr.mxu1 %v11466_v7 }
 0x511   :  { %9813 = vmatmul.mubr.msk.f32.vlgmr.msra.gmra.mrb[84].mxu1 %vm4859_vm3, %v5209_v14  ;;  %9818 = vmatmul.mubr.msk.f32.vlgmr.msra.gmra.mrb[78].mxu0 %vm4859_vm3, %v5210_v55 }
 0x512   :  { %9821 = vmatpush3.xpose.msk.msra.mxu1 %vm4859_vm3, %v1389_v44  ;;  %9822 = vmatprep.mubr.msk.f32.mxu1 %vm10217_vm1, %v11466_v7 }
 0x515   :  { %9823 = vmatmul.mubr.msk.f32.vlgmr.msra.gmra.mrb[86].mxu1 %vm4859_vm3, %v5211_v3 }
 0x580   :  { %v5360_v1 = vpop.f32.mrb[56].mxu1 }
 0x581   :  { %v5284_v16 = vpop.f32.mrb[48].mxu0  ;;  %v9674_v39 = vpop.f32.mrb[57].mxu1 }
 0x582   :  { %7644 = vxpose.xlu1.b32.start.end [1/1] (short) (narrow) %v5284_v16, 8  ;;  %v9669_v40 = vpop.f32.mrb[49].mxu0  ;;  %v8925_v16 = vld [vmem:[#allocation13 + $0x8] sm:$0xff]  ;;  %v8926_v39 = vld [vmem:[#allocation13 + $0x10] sm:$0xff] }
 0x584   :  { %v5512_v13 = vpop.f32.mrb[58].mxu1 }
 0x585   :  { %v9684_v21 = vpop.f32.mrb[59].mxu1 }
 0x586   :  { %7676 = vxpose.xlu1.b32.start.end [1/1] (short) (narrow) %v5360_v1, 8  ;;  %v8924_v1 = vld [vmem:[#allocation13] sm:$0xff] }
 0x587   :  { %v9869_v40 = vpack.c.bf16 %v8925_v16, %v8924_v1 }
 0x588   :  { %v5664_v19 = vpop.f32.mrb[60].mxu1 }
 0x589   :  { %v5436_v18 = vpop.f32.mrb[50].mxu0  ;;  %v9694_v47 = vpop.f32.mrb[61].mxu1  ;;  %9870 = vmatprep.subr.bf16.mxu0 %v9869_v40 }
 0x58a   :  { %7804 = vxpose.xlu1.b32.start.end [1/1] (short) (narrow) %v5664_v19, 8  ;;  %7708 = vxpose.xlu0.b32.start.end [1/1] (short) (narrow) %v5436_v18, 8  ;;  %v9679_v58 = vpop.f32.mrb[51].mxu0 }
 0x58b   :  { %9872 = vmatpush3.bf16.msra.mxu0 %v9869_v40 }
 0x58c   :  { %v5816_v29 = vpop.f32.mrb[62].mxu1 }
 0x58d   :  { %v5588_v7 = vpop.f32.mrb[52].mxu0  ;;  %v9704_v30 = vpop.f32.mrb[63].mxu1 }
 0x58e   :  { %7772 = vxpose.xlu0.b32.start.end [1/1] (short) (narrow) %v5588_v7, 8  ;;  %v9689_v33 = vpop.f32.mrb[53].mxu0 }
 0x590   :  { %v5968_v42 = vpop.f32.mrb[64].mxu1 }
 0x591   :  { %v5740_v20 = vpop.f32.mrb[54].mxu0  ;;  %v9714_v31 = vpop.f32.mrb[65].mxu1 }
 0x592   :  { %7740 = vxpose.xlu0.b32.start.end [1/1] (short) (narrow) %v5512_v13, 8  ;;  %v9699_v23 = vpop.f32.mrb[55].mxu0  ;;  %v8927_v13 = vld [vmem:[#allocation13 + $0x18] sm:$0xff] }
 0x593   :  { %v9873_v21 = vpack.c.bf16 %v8927_v13, %v8926_v39 }
 0x594   :  { %v6120_v43 = vpop.f32.mrb[66].mxu1 }
 0x595   :  { %v5892_v61 = vpop.f32.mrb[56].mxu0  ;;  %v9724_v59 = vpop.f32.mrb[67].mxu1  ;;  %9874 = vmatprep.subr.bf16.mxu0 %v9873_v21 }
 0x596   :  { %7836 = vxpose.xlu0.b32.start.end [1/1] (short) (narrow) %v5740_v20, 8  ;;  %7900 = vxpose.xlu1.b32.start.end [1/1] (short) (narrow) %v5892_v61, 8  ;;  %v9709_v11 = vpop.f32.mrb[57].mxu0 }
 0x597   :  { %9876 = vmatpush3.bf16.msra.mxu0 %v9873_v21 }
 0x598   :  { %v6272_v15 = vpop.f32.mrb[68].mxu1 }
 0x599   :  { %v6044_v9 = vpop.f32.mrb[58].mxu0  ;;  %v9734_v62 = vpop.f32.mrb[69].mxu1 }
 0x59a   :  { %7868 = vxpose.xlu0.b32.start.end [1/1] (short) (narrow) %v5816_v29, 8  ;;  %7932 = vxpose.xlu1.b32.start.end [1/1] (short) (narrow) %v5968_v42, 8  ;;  %v9719_v27 = vpop.f32.mrb[59].mxu0 }
 0x59c   :  { %v6424_v10 = vpop.f32.mrb[70].mxu1 }
 0x59d   :  { %v6196_v28 = vpop.f32.mrb[60].mxu0  ;;  %v9744_v41 = vpop.f32.mrb[71].mxu1 }
 0x59e   :  { %7964 = vxpose.xlu0.b32.start.end [1/1] (short) (narrow) %v6044_v9, 8  ;;  %8028 = vxpose.xlu1.b32.start.end [1/1] (short) (narrow) %v6196_v28, 8  ;;  %v9729_v48 = vpop.f32.mrb[61].mxu0 }
 0x5a0   :  { %v6576_v8 = vpop.f32.mrb[72].mxu1 }
 0x5a1   :  { %v6348_v35 = vpop.f32.mrb[62].mxu0  ;;  %v9754_v12 = vpop.f32.mrb[73].mxu1 }
 0x5a2   :  { %7996 = vxpose.xlu0.b32.start.end [1/1] (short) (narrow) %v6120_v43, 8  ;;  %8060 = vxpose.xlu1.b32.start.end [1/1] (short) (narrow) %v6272_v15, 8  ;;  %v9739_v5 = vpop.f32.mrb[63].mxu0 }
 0x5a5   :  { %v6500_v38 = vpop.f32.mrb[64].mxu0 }
 0x5a6   :  { %8092 = vxpose.xlu0.b32.start.end [1/1] (short) (narrow) %v6348_v35, 8  ;;  %8156 = vxpose.xlu1.b32.start.end [1/1] (short) (narrow) %v6500_v38, 8  ;;  %v9749_v22 = vpop.f32.mrb[65].mxu0 }
 0x5a8   :  { %v6728_v17 = vpop.f32.mrb[74].mxu1 }
 0x5a9   :  { %v6652_v6 = vpop.f32.mrb[66].mxu0  ;;  %v9764_v36 = vpop.f32.mrb[75].mxu1 }
 0x5aa   :  { %8124 = vxpose.xlu0.b32.start.end [1/1] (short) (narrow) %v6424_v10, 8  ;;  %8188 = vxpose.xlu1.b32.start.end [1/1] (short) (narrow) %v6576_v8, 8  ;;  %v9759_v37 = vpop.f32.mrb[67].mxu0 }
 0x5ad   :  { %v6804_v49 = vpop.f32.mrb[68].mxu0 }
 0x5ae   :  { %8220 = vxpose.xlu0.b32.start.end [1/1] (short) (narrow) %v6652_v6, 8  ;;  %8284 = vxpose.xlu1.b32.start.end [1/1] (short) (narrow) %v6804_v49, 8  ;;  %v9769_v54 = vpop.f32.mrb[69].mxu0 }
 0x5b0   :  { %v6880_v32 = vpop.f32.mrb[76].mxu1 }
 0x5b1   :  { %v6956_v26 = vpop.f32.mrb[70].mxu0  ;;  %v9774_v52 = vpop.f32.mrb[77].mxu1 }
 0x5b2   :  { %8252 = vxpose.xlu0.b32.start.end [1/1] (short) (narrow) %v6728_v17, 8  ;;  %8316 = vxpose.xlu1.b32.start.end [1/1] (short) (narrow) %v6880_v32, 8  ;;  %v9779_v46 = vpop.f32.mrb[71].mxu0 }
 0x5b4   :  { %v7032_v34 = vpop.f32.mrb[78].mxu1 }
 0x5b5   :  { %v9784_v0 = vpop.f32.mrb[79].mxu1 }
 0x5b6   :  { %8348 = vxpose.xlu0.b32.start.end [1/1] (short) (narrow) %v6956_v26, 8 }
 0x5ba   :  { %8380 = vxpose.xlu0.b32.start.end [1/1] (short) (narrow) %v7032_v34, 8 }
 0x5d4   :  { %v7108_v50 = vpop.f32.mrb[72].mxu0 }
 0x5d5   :  { %8412 = vxpose.xlu1.b32.start.end [1/1] (short) (narrow) %v7108_v50, 8  ;;  %v9789_v2 = vpop.f32.mrb[73].mxu0 }
 0x5d8   :  { %v7184_v24 = vpop.f32.mrb[80].mxu1 }
 0x5d9   :  { %v9794_v56 = vpop.f32.mrb[81].mxu1  ;;  %8444 = vxpose.xlu1.b32.start.end [1/1] (short) (narrow) %v7184_v24, 8 }
 0x5dc   :  { %v7260_v63 = vpop.f32.mrb[74].mxu0 }
 0x5dd   :  { %8476 = vxpose.xlu0.b32.start.end [1/1] (short) (narrow) %v7260_v63, 8  ;;  %v9799_v60 = vpop.f32.mrb[75].mxu0 }
 0x5e0   :  { %v7336_v45 = vpop.f32.mrb[82].mxu1  ;;  %v7412_v53 = vpop.f32.mrb[76].mxu0 }
 0x5e1   :  { %v9804_v51 = vpop.f32.mrb[83].mxu1  ;;  %8508 = vxpose.xlu0.b32.start.end [1/1] (short) (narrow) %v7336_v45, 8  ;;  %8540 = vxpose.xlu1.b32.start.end [1/1] (short) (narrow) %v7412_v53, 8  ;;  %v9809_v4 = vpop.f32.mrb[77].mxu0 }
 0x5e4   :  { %v7488_v25 = vpop.f32.mrb[84].mxu1  ;;  %v7564_v55 = vpop.f32.mrb[78].mxu0 }
 0x5e5   :  { %v9814_v14 = vpop.f32.mrb[85].mxu1  ;;  %8572 = vxpose.xlu1.b32.start.end [1/1] (short) (narrow) %v7488_v25, 8  ;;  %v9819_v44 = vpop.f32.mrb[79].mxu0 }
 0x5e8   :  { %v7640_v57 = vpop.f32.mrb[86].mxu1 }
 0x5e9   :  { %v9824_v3 = vpop.f32.mrb[87].mxu1  ;;  %8604 = vxpose.xlu1.b32.start.end [1/1] (short) (narrow) %v7564_v55, 8 }
 0x5ed   :  { %8636 = vxpose.xlu1.b32.start.end [1/1] (short) (narrow) %v7640_v57, 8 }
 0x602   :  { %v7660_v19 = vpop.trf.xlu1 }
 0x603   :  { %8668 = vxpose.xlu0.b32.start [1/4] (short) (narrow) %v7660_v19, 8 }
 0x606   :  { %v7692_v18 = vpop.trf.xlu1 }
 0x607   :  { %8669 = vxpose.xlu0.b32.cont [2/4] (short) (narrow) %v7692_v18, 8 }
 0x60a   :  { %v7724_v47 = vpop.trf.xlu0  ;;  %v7820_v29 = vpop.trf.xlu1 }
 0x60b   :  { %8670 = vxpose.xlu0.b32.cont [3/4] (short) (narrow) %v7724_v47, 8 }
 0x60e   :  { %v7788_v58 = vpop.trf.xlu0 }
 0x60f   :  { %8700 = vxpose.xlu1.b32.start [1/4] (short) (narrow) %v7788_v58, 8 }
 0x612   :  { %v7756_v7 = vpop.trf.xlu0 }
 0x613   :  { %8701 = vxpose.xlu1.b32.cont [2/4] (short) (narrow) %v7820_v29, 8  ;;  %8671 = vxpose.xlu0.b32.end [4/4] (short) (narrow) %v7756_v7, 8 }
 0x616   :  { %v7852_v30 = vpop.trf.xlu0  ;;  %v7916_v33 = vpop.trf.xlu1 }
 0x617   :  { %8702 = vxpose.xlu1.b32.cont [3/4] (short) (narrow) %v7852_v30, 8  ;;  %8732 = vxpose.xlu0.b32.start [1/4] (short) (narrow) %v7916_v33, 8 }
 0x61a   :  { %v7884_v42 = vpop.trf.xlu0  ;;  %v7948_v20 = vpop.trf.xlu1 }
 0x61b   :  { %8703 = vxpose.xlu1.b32.end [4/4] (short) (narrow) %v7884_v42, 8  ;;  %8733 = vxpose.xlu0.b32.cont [2/4] (short) (narrow) %v7948_v20, 8 }
 0x61e   :  { %v7980_v31 = vpop.trf.xlu0  ;;  %v8044_v23 = vpop.trf.xlu1 }
 0x61f   :  { %8764 = vxpose.xlu1.b32.start [1/4] (short) (narrow) %v8044_v23, 8  ;;  %8734 = vxpose.xlu0.b32.cont [3/4] (short) (narrow) %v7980_v31, 8 }
 0x622   :  { %v8012_v43 = vpop.trf.xlu0  ;;  %v8076_v61 = vpop.trf.xlu1 }
 0x623   :  { %8765 = vxpose.xlu1.b32.cont [2/4] (short) (narrow) %v8076_v61, 8  ;;  %8735 = vxpose.xlu0.b32.end [4/4] (short) (narrow) %v8012_v43, 8 }
 0x626   :  { %v8108_v59 = vpop.trf.xlu0  ;;  %v8172_v11 = vpop.trf.xlu1 }
 0x627   :  { %8766 = vxpose.xlu1.b32.cont [3/4] (short) (narrow) %v8108_v59, 8  ;;  %8796 = vxpose.xlu0.b32.start [1/4] (short) (narrow) %v8172_v11, 8 }
 0x62a   :  { %v8140_v15 = vpop.trf.xlu0  ;;  %v8204_v9 = vpop.trf.xlu1 }
 0x62b   :  { %8767 = vxpose.xlu1.b32.end [4/4] (short) (narrow) %v8140_v15, 8  ;;  %8797 = vxpose.xlu0.b32.cont [2/4] (short) (narrow) %v8204_v9, 8 }
 0x62e   :  { %v8236_v62 = vpop.trf.xlu0  ;;  %v8300_v27 = vpop.trf.xlu1 }
 0x62f   :  { %8828 = vxpose.xlu1.b32.start [1/4] (short) (narrow) %v8300_v27, 8  ;;  %8798 = vxpose.xlu0.b32.cont [3/4] (short) (narrow) %v8236_v62, 8 }
 0x632   :  { %v8268_v10 = vpop.trf.xlu0  ;;  %v8332_v28 = vpop.trf.xlu1 }
 0x633   :  { %8829 = vxpose.xlu1.b32.cont [2/4] (short) (narrow) %v8332_v28, 8  ;;  %8799 = vxpose.xlu0.b32.end [4/4] (short) (narrow) %v8268_v10, 8 }
 0x636   :  { %v8364_v41 = vpop.trf.xlu0 }
 0x637   :  { %8830 = vxpose.xlu1.b32.cont [3/4] (short) (narrow) %v8364_v41, 8 }
 0x63a   :  { %v8396_v48 = vpop.trf.xlu0 }
 0x63b   :  { %8831 = vxpose.xlu1.b32.end [4/4] (short) (narrow) %v8396_v48, 8 }
 0x655   :  { %v8428_v8 = vpop.trf.xlu1 }
 0x656   :  { %8860 = vxpose.xlu0.b32.start [1/4] (short) (narrow) %v8428_v8, 8 }
 0x659   :  { %v8460_v35 = vpop.trf.xlu1 }
 0x65a   :  { %8861 = vxpose.xlu0.b32.cont [2/4] (short) (narrow) %v8460_v35, 8 }
 0x65d   :  { %v8492_v12 = vpop.trf.xlu0 }
 0x65e   :  { %8862 = vxpose.xlu0.b32.cont [3/4] (short) (narrow) %v8492_v12, 8 }
 0x661   :  { %v8556_v5 = vpop.trf.xlu1  ;;  %v8524_v38 = vpop.trf.xlu0 }
 0x662   :  { %8892 = vxpose.xlu1.b32.start [1/4] (short) (narrow) %v8556_v5, 8  ;;  %8863 = vxpose.xlu0.b32.end [4/4] (short) (narrow) %v8524_v38, 8 }
 0x665   :  { %v8588_v22 = vpop.trf.xlu1 }
 0x666   :  { %8893 = vxpose.xlu1.b32.cont [2/4] (short) (narrow) %v8588_v22, 8 }
 0x669   :  { %v8620_v17 = vpop.trf.xlu1 }
 0x66a   :  { %8894 = vxpose.xlu1.b32.cont [3/4] (short) (narrow) %v8620_v17, 8 }
 0x66d   :  { %v8652_v6 = vpop.trf.xlu1 }
 0x66e   :  { %8895 = vxpose.xlu1.b32.end [4/4] (short) (narrow) %v8652_v6, 8 }
 0x687   :  { %v8684_v36 = vpop.trf.xlu0 }
 0x688   :  { %9833 = vmatprep.mubr.msk.f32.mxu0 %vm158_vm0, %v8684_v36 }
 0x68f   :  { %v8716_v37 = vpop.trf.xlu1 }
 0x690   :  { %9834 = vmatmul.mubr.msk.f32.vlgmr.msra.gmra.mrb[80].mxu0 %vm158_vm0, %v8716_v37 }
 0x697   :  { %v8748_v49 = vpop.trf.xlu0 }
 0x698   :  { %9836 = vmatprep.mubr.msk.f32.mxu0 %vm158_vm0, %v8748_v49 }
 0x69f   :  { %v8780_v54 = vpop.trf.xlu1 }
 0x6a0   :  { %9837 = vmatmul.mubr.msk.f32.gmra.mrb[82].mxu0 %vm158_vm0, %v8780_v54 }
 0x6a7   :  { %v8812_v32 = vpop.trf.xlu0 }
 0x6a8   :  { %9839 = vmatprep.mubr.msk.f32.mxu0 %vm158_vm0, %v8812_v32 }
 0x6af   :  { %v8844_v26 = vpop.trf.xlu1 }
 0x6b0   :  { %9840 = vmatmul.mubr.msk.f32.gmra.mrb[84].mxu0 %vm158_vm0, %v8844_v26 }
 0x6d6   :  { %v8876_v52 = vpop.trf.xlu0 }
 0x6d7   :  { %9842 = vmatprep.mubr.msk.f32.mxu0 %vm158_vm0, %v8876_v52 }
 0x6e2   :  { %v8908_v46 = vpop.trf.xlu1 }
 0x6e3   :  { %9843 = vmatmul.mubr.msk.f32.gmra.mrb[86].mxu0 %vm158_vm0, %v8908_v46 }
 0x763   :  { %v9835_v34 = vpop.f32.mrb[80].mxu0 }
 0x764   :  { %9058 = vst.msk [vmem:[#allocation14 + $0x8] sm:$0xff] %vm158_vm0, %v9835_v34  ;;  %v9018_v0 = vpop.f32.mrb[81].mxu0 }
 0x765   :  { %9057 = vst.msk [vmem:[#allocation14] sm:$0xff] %vm158_vm0, %v9018_v0 }
 0x773   :  { %v9838_v50 = vpop.f32.mrb[82].mxu0 }
 0x774   :  { %9060 = vst.msk [vmem:[#allocation14 + $0x18] sm:$0xff] %vm158_vm0, %v9838_v50  ;;  %v9028_v2 = vpop.f32.mrb[83].mxu0 }
 0x775   :  { %9059 = vst.msk [vmem:[#allocation14 + $0x10] sm:$0xff] %vm158_vm0, %v9028_v2 }
 0x783   :  { %v9841_v24 = vpop.f32.mrb[84].mxu0 }
 0x784   :  { %9062 = vst.msk [vmem:[#allocation14 + $0x28] sm:$0xff] %vm158_vm0, %v9841_v24  ;;  %v9038_v56 = vpop.f32.mrb[85].mxu0 }
 0x785   :  { %9061 = vst.msk [vmem:[#allocation14 + $0x20] sm:$0xff] %vm158_vm0, %v9038_v56 }
 0x7b6   :  { %v9844_v63 = vpop.f32.mrb[86].mxu0 }
 0x7b7   :  { %9064 = vst.msk [vmem:[#allocation14 + $0x38] sm:$0xff] %vm158_vm0, %v9844_v63  ;;  %v9048_v60 = vpop.f32.mrb[87].mxu0 }
 0x7b8   :  { %9063 = vst.msk [vmem:[#allocation14 + $0x30] sm:$0xff] %vm158_vm0, %v9048_v60 }
 0x7b9   :  { %10186 = shalt.err (!%p10183_p4)
}
 0x7ba   :  { %s10187_s27 = scalar_lea.hbm %s11401_s7, 1024 }
 0x7bb   :  { %p10188_p5 = scmp.ne.s32.totalorder %s11401_s7, %s10187_s27  ;;  %p10191_p6 = scmp.lt.u32.totalorder %s10187_s27, %s11401_s7 }
 0x7bd   :  { %p10193_p7 = pnand %p10191_p6, %p10188_p5 }
 0x7bf   :  { %10196 = shalt.err (!%p10193_p7)
}
 0x7c0   :  { %9076 = dma.vmem_to_hbm [thread:$0]  %s9071_s16, 1024, %s11401_s7, [#allocation4], %s10209_s13, %s10209_s13, %s10210_s14  }
 0x7c1   :  { %10205 = dma.done.wait [#allocation4], 1024  }
 0x7c2   :  { %10206 = vsyncadd [#allocation4], 4294966272 }
 0x7c3   :  { %9080 = vsyncpa [#allocation3], 1 }
 0x7c4   :  { %9081 = vsyncpa [#allocation6], 1 }
 0x7c5   :  { %9082 = vsyncpa [#allocation9], 1 }
 0x7c6   :  { %9083 = vsyncpa [#allocation12], 1 }
 0x7c7   :  { %9084 = vsyncpa [#allocation4], 1 }

</bundles_post_ra>
